<compile_context>
chip_gen: v7x
topology: tpu7x:2x2x1
jax: 0.10.0
libtpu: 0.0.40
codegen_flags: <defaults>
</compile_context>

<pallas_src>
import math
from functools import partial

import numpy as np
import jax
import jax.numpy as jnp
from jax import lax
from jax.experimental import pallas as pl
from jax.experimental.pallas import tpu as pltpu

# ----------------------- model config (small, deterministic) -----------------------
NUM_LAYERS = 2
D_MODEL = 32
NUM_HEADS = 4
DEPTH = D_MODEL // NUM_HEADS          # 8
DFF = 64
VOCAB = 128
B = 2
S = 8
BS = B * S                            # 16
QKV_PAD = 128                         # padded fused Q|K|V width (lane-dense)
ROPE_BASE = 10000.0
LN_EPS = 1e-6
NEG_INF = -1e9

# --------------------------- packed weight-slab layout -----------------------------
# wmats: (WM_ROWS, 128) f32
OFF_EMB = 0                           # rows 0:128, cols 0:32  (pre-scaled embedding)
OFF_FINAL = OFF_EMB + VOCAB           # rows 128:160, cols 0:128 (final_w)
OFF_LAYER0 = OFF_FINAL + D_MODEL      # 160
L_QKV = 0                             # +0:32   cols 0:96  wq|wk|wv (96:128 zero)
L_GLU12 = 32                          # +32:64  cols 0:128 glu1|glu2
L_GD = 64                             # +64:96  cols 0:32 block-diag G, 32:64 dense_w
L_GLU3 = 96                           # +96:160 cols 0:32  glu3
LAYER_ROWS = 160
WM_ROWS = OFF_LAYER0 + NUM_LAYERS * LAYER_ROWS        # 480

# vecs: (VEC_ROWS, 128) f32, one vector per row (zero padded to 128 lanes)
V_DEC_LN_G = 0
V_DEC_LN_B = 1
V_FINAL_B = 2
V_LAYER0 = 8
V_QKV_B = 0
V_GLU12_B = 1
V_DENSE_B = 2
V_GLU3_B = 3
V_LN1_G = 4
V_LN1_B = 5
V_LN2_G = 6
V_LN2_B = 7
V_LAYER_ROWS = 8
VEC_ROWS = V_LAYER0 + NUM_LAYERS * V_LAYER_ROWS       # 24


# ================================ fused Pallas kernel ==============================
def _make_kernel(apply_g: bool):
    scale = 1.0 / math.sqrt(DEPTH)

    def kernel(ids_ref, mask_ref, rope_ref, wm_ref, vec_ref,
               logits_ref, dec_ref, kv_ref):
        f32 = jnp.float32

        def layer_norm(x, g_row, b_row):
            mean = jnp.mean(x, axis=-1, keepdims=True)
            c = x - mean
            var = jnp.mean(c * c, axis=-1, keepdims=True)
            return c * lax.rsqrt(var + LN_EPS) * g_row + b_row

        # ---- embedding gather fused in-kernel (one-hot matmul, one MXU push) ----
        ids = ids_ref[...]                                           # (BS,1) int32
        iota = lax.broadcasted_iota(jnp.int32, (BS, VOCAB), 1)
        onehot = (iota == ids).astype(f32)                           # (BS,VOCAB)
        emb = wm_ref[OFF_EMB:OFF_EMB + VOCAB, 0:D_MODEL]             # sqrt(d_model) folded
        x = jnp.dot(onehot, emb, preferred_element_type=f32)         # (BS, d_model)
        x = layer_norm(x,
                       vec_ref[V_DEC_LN_G:V_DEC_LN_G + 1, 0:D_MODEL],
                       vec_ref[V_DEC_LN_B:V_DEC_LN_B + 1, 0:D_MODEL])

        cos_t = rope_ref[0:BS, :]               # (BS,128)  cos (1 on v/pad lanes)
        sin_nx = rope_ref[BS:2 * BS, :]         # weight for next-lane values (even lanes)
        sin_pv = rope_ref[2 * BS:3 * BS, :]     # weight for prev-lane values (odd lanes)
        addmask = mask_ref[...]                 # (BS,BS) additive (-1e9) block mask

        for l in range(NUM_LAYERS):
            base = OFF_LAYER0 + l * LAYER_ROWS
            vb = V_LAYER0 + l * V_LAYER_ROWS

            # fused Q|K|V projection, 128-lane padded (one MXU push)
            qkv = (jnp.dot(x, wm_ref[base + L_QKV:base + L_QKV + D_MODEL, :],
                           preferred_element_type=f32)
                   + vec_ref[vb + V_QKV_B:vb + V_QKV_B + 1, :])      # (BS,128)

            # interleaved RoPE on q|k lanes (0:64); v / pad lanes pass through
            # (cos=1, sin=0 there).  Pair swap via XLU lane rotations.
            nxt = pltpu.roll(qkv, QKV_PAD - 1, axis=1)               # nxt[j] = qkv[j+1]
            prv = pltpu.roll(qkv, 1, axis=1)                         # prv[j] = qkv[j-1]
            roped = qkv * cos_t + nxt * sin_nx + prv * sin_pv

            q = roped[:, 0:D_MODEL]
            k = roped[:, D_MODEL:2 * D_MODEL]
            v = qkv[:, 2 * D_MODEL:3 * D_MODEL]

            # KV cache written into the lane-dense 128-wide slab [K_l0|V_l0|K_l1|V_l1]
            o = l * 2 * D_MODEL
            kv_ref[:, o:o + D_MODEL] = k
            kv_ref[:, o + D_MODEL:o + 2 * D_MODEL] = v

            # cached energy-curvature tensor G: one block-diagonal matmul on roped Q,
            # skipped at trace time when G is identity (this ablation).
            # TODO(synk): plgatt.plga_layer source not provided; cached-G path is
            # implemented as G-conditioned masked scaled dot-product attention.
            if apply_g:
                qg = jnp.dot(q, wm_ref[base + L_GD:base + L_GD + D_MODEL, 0:D_MODEL],
                             preferred_element_type=f32)
            else:
                qg = q

            # per-head masked SDPA; both batches fused via the block additive mask.
            heads = []
            for h in range(NUM_HEADS):
                c0 = h * DEPTH
                qh = qg[:, c0:c0 + DEPTH]
                kh = k[:, c0:c0 + DEPTH]
                vh = v[:, c0:c0 + DEPTH]
                s = lax.dot_general(qh, kh, (((1,), (1,)), ((), ())),
                                    preferred_element_type=f32) * scale + addmask
                s = s - jnp.max(s, axis=-1, keepdims=True)
                p = jnp.exp(s)
                p = p * pl.reciprocal(jnp.sum(p, axis=-1, keepdims=True), approx=True)
                heads.append(jnp.dot(p, vh, preferred_element_type=f32))
            o_heads = jnp.concatenate(heads, axis=-1)                 # (BS, d_model)

            # single dense projection over all heads
            attn = (jnp.dot(o_heads,
                            wm_ref[base + L_GD:base + L_GD + D_MODEL,
                                   D_MODEL:2 * D_MODEL],
                            preferred_element_type=f32)
                    + vec_ref[vb + V_DENSE_B:vb + V_DENSE_B + 1, 0:D_MODEL])

            out1 = layer_norm(attn + x,
                              vec_ref[vb + V_LN1_G:vb + V_LN1_G + 1, 0:D_MODEL],
                              vec_ref[vb + V_LN1_B:vb + V_LN1_B + 1, 0:D_MODEL])

            # SwiGLU FFN with fused w1|w2 (lane-dense 128-wide intermediate)
            h12 = (jnp.dot(out1,
                           wm_ref[base + L_GLU12:base + L_GLU12 + D_MODEL, :],
                           preferred_element_type=f32)
                   + vec_ref[vb + V_GLU12_B:vb + V_GLU12_B + 1, :])
            h1 = h12[:, 0:DFF]
            h2 = h12[:, DFF:2 * DFF]
            ffn_in = (h1 * jax.nn.sigmoid(h1)) * h2                   # silu(x1) * x2
            ffn = (jnp.dot(ffn_in,
                           wm_ref[base + L_GLU3:base + L_GLU3 + DFF, 0:D_MODEL],
                           preferred_element_type=f32)
                   + vec_ref[vb + V_GLU3_B:vb + V_GLU3_B + 1, 0:D_MODEL])

            x = layer_norm(ffn + out1,
                           vec_ref[vb + V_LN2_G:vb + V_LN2_G + 1, 0:D_MODEL],
                           vec_ref[vb + V_LN2_B:vb + V_LN2_B + 1, 0:D_MODEL])

        dec_ref[...] = x
        logits_ref[...] = (jnp.dot(x, wm_ref[OFF_FINAL:OFF_FINAL + D_MODEL, :],
                                   preferred_element_type=f32)
                           + vec_ref[V_FINAL_B:V_FINAL_B + 1, :])

    return kernel


# =============================== jitted forward (thin) ==============================
@partial(jax.jit, static_argnames=("apply_g",))
def _pldr_forward_jit(inp, addmask, rope_tab, wmats, vecs, *, apply_g):
    ids2d = inp.reshape(BS, 1).astype(jnp.int32)
    out_shape = (
        jax.ShapeDtypeStruct((BS, VOCAB), jnp.float32),                    # logits
        jax.ShapeDtypeStruct((BS, D_MODEL), jnp.float32),                  # decoder out
        jax.ShapeDtypeStruct((BS, NUM_LAYERS * 2 * D_MODEL), jnp.float32), # packed KV
    )
    logits, dec, kv = pl.pallas_call(
        _make_kernel(apply_g),
        out_shape=out_shape,
    )(ids2d, addmask, rope_tab, wmats, vecs)

    logits = logits.reshape(B, S, VOCAB)
    dec = dec.reshape(B, S, D_MODEL)
    kvcachelst = []
    for l in range(NUM_LAYERS):
        o = l * 2 * D_MODEL
        k = kv[:, o:o + D_MODEL].reshape(B, S, NUM_HEADS, DEPTH)
        v = kv[:, o + D_MODEL:o + 2 * D_MODEL].reshape(B, S, NUM_HEADS, DEPTH)
        kvcachelst.append((k, v))
    return logits, dec, kvcachelst


def pldr_model(inp, additive_mask, packed):
    """PLDR_Model.forward with kvcachelst=None (prefill).
    Returns (logits, decoder_output, kvcache_list)."""
    # TODO(synk): kvcache-consuming decode path not implemented (only kvcache=None path).
    return _pldr_forward_jit(inp, additive_mask, packed["rope"],
                             packed["wmats"], packed["vecs"],
                             apply_g=packed["apply_g"])


# ===================== one-time host-side packing (outside jit) =====================
def _rope_table_packed():
    """(3*BS, 128) f32: [cos | sin_next | sin_prev], torchtune interleaved RoPE.
    cos=1 / sin=0 on V and pad lanes so the same tables pass V through untouched."""
    half = DEPTH // 2
    idx = np.arange(half, dtype=np.float64)
    theta = 1.0 / (ROPE_BASE ** (2.0 * idx / DEPTH))
    pos = np.arange(S, dtype=np.float64)
    ang = pos[:, None] * theta[None, :]                      # (S, half)
    cos_d = np.repeat(np.cos(ang), 2, axis=1)                # (S, DEPTH)
    sin_d = np.repeat(np.sin(ang), 2, axis=1)
    even = (np.arange(DEPTH) % 2 == 0)
    sin_next_d = np.where(even, -sin_d, 0.0)                 # even lane j uses -sin*x[j+1]
    sin_prev_d = np.where(~even, sin_d, 0.0)                 # odd  lane j uses +sin*x[j-1]

    cos_m = np.tile(cos_d, (1, NUM_HEADS))                   # (S, d_model)
    sin_next_m = np.tile(sin_next_d, (1, NUM_HEADS))
    sin_prev_m = np.tile(sin_prev_d, (1, NUM_HEADS))

    cos128 = np.ones((S, QKV_PAD))
    sinN = np.zeros((S, QKV_PAD))
    sinP = np.zeros((S, QKV_PAD))
    for c0 in (0, D_MODEL):                                  # q lanes and k lanes
        cos128[:, c0:c0 + D_MODEL] = cos_m
        sinN[:, c0:c0 + D_MODEL] = sin_next_m
        sinP[:, c0:c0 + D_MODEL] = sin_prev_m

    cosF = np.tile(cos128, (B, 1))
    sinNF = np.tile(sinN, (B, 1))
    sinPF = np.tile(sinP, (B, 1))
    return np.concatenate([cosF, sinNF, sinPF], axis=0).astype(np.float32)


def prepare_attention_mask(look_ahead_mask):
    """(B,1,S,S) 0/1 mask -> (B*S, B*S) additive mask (-1e9 at masked / cross-batch)."""
    m = np.asarray(jax.device_get(look_ahead_mask), dtype=np.float32)[:, 0, :, :]
    Bn, Sn, _ = m.shape
    big = np.full((Bn * Sn, Bn * Sn), NEG_INF, np.float32)
    for b in range(Bn):
        big[b * Sn:(b + 1) * Sn, b * Sn:(b + 1) * Sn] = m[b] * NEG_INF
    return jnp.asarray(big)


def pack_model(params, gcachelst):
    """One-time numpy packing of all weights into two lane-dense (N,128) slabs."""
    def npf(a):
        return np.asarray(jax.device_get(a), dtype=np.float32)

    wm = np.zeros((WM_ROWS, 128), np.float32)
    vec = np.zeros((VEC_ROWS, 128), np.float32)

    wm[OFF_EMB:OFF_EMB + VOCAB, 0:D_MODEL] = npf(params["embedding"]) * math.sqrt(float(D_MODEL))
    wm[OFF_FINAL:OFF_FINAL + D_MODEL, 0:VOCAB] = npf(params["final_w"])

    vec[V_DEC_LN_G, 0:D_MODEL] = npf(params["dec_ln_g"]).reshape(-1)
    vec[V_DEC_LN_B, 0:D_MODEL] = npf(params["dec_ln_b"]).reshape(-1)
    vec[V_FINAL_B, 0:VOCAB] = npf(params["final_b"]).reshape(-1)

    g_all = [npf(g) for g in gcachelst]                      # each (H, depth, depth)
    apply_g = any(not np.allclose(g_all[l][h], np.eye(DEPTH), atol=0.0)
                  for l in range(NUM_LAYERS) for h in range(NUM_HEADS))

    for l, p in enumerate(params["layers"]):
        base = OFF_LAYER0 + l * LAYER_ROWS
        vb = V_LAYER0 + l * V_LAYER_ROWS

        r = base + L_QKV
        wm[r:r + D_MODEL, 0:D_MODEL] = npf(p["wq_w"])
        wm[r:r + D_MODEL, D_MODEL:2 * D_MODEL] = npf(p["wk_w"])
        wm[r:r + D_MODEL, 2 * D_MODEL:3 * D_MODEL] = npf(p["wv_w"])

        r = base + L_GLU12
        wm[r:r + D_MODEL, 0:DFF] = npf(p["glu1_w"])
        wm[r:r + D_MODEL, DFF:2 * DFF] = npf(p["glu2_w"])

        r = base + L_GD
        for h in range(NUM_HEADS):                           # block-diagonal cached G
            wm[r + h * DEPTH:r + (h + 1) * DEPTH, h * DEPTH:(h + 1) * DEPTH] = g_all[l][h]
        wm[r:r + D_MODEL, D_MODEL:2 * D_MODEL] = npf(p["dense_w"])

        r = base + L_GLU3
        wm[r:r + DFF, 0:D_MODEL] = npf(p["glu3_w"])

        vec[vb + V_QKV_B, 0:D_MODEL] = npf(p["wq_b"]).reshape(-1)
        vec[vb + V_QKV_B, D_MODEL:2 * D_MODEL] = npf(p["wk_b"]).reshape(-1)
        vec[vb + V_QKV_B, 2 * D_MODEL:3 * D_MODEL] = npf(p["wv_b"]).reshape(-1)
        vec[vb + V_GLU12_B, 0:DFF] = npf(p["glu1_b"]).reshape(-1)
        vec[vb + V_GLU12_B, DFF:2 * DFF] = npf(p["glu2_b"]).reshape(-1)
        vec[vb + V_DENSE_B, 0:D_MODEL] = npf(p["dense_b"]).reshape(-1)
        vec[vb + V_GLU3_B, 0:D_MODEL] = npf(p["glu3_b"]).reshape(-1)
        vec[vb + V_LN1_G, 0:D_MODEL] = npf(p["ln1_g"]).reshape(-1)
        vec[vb + V_LN1_B, 0:D_MODEL] = npf(p["ln1_b"]).reshape(-1)
        vec[vb + V_LN2_G, 0:D_MODEL] = npf(p["ln2_g"]).reshape(-1)
        vec[vb + V_LN2_B, 0:D_MODEL] = npf(p["ln2_b"]).reshape(-1)

    return {
        "wmats": jnp.asarray(wm),
        "vecs": jnp.asarray(vec),
        "rope": jnp.asarray(_rope_table_packed()),
        "apply_g": bool(apply_g),
    }


# ============================ deterministic parameter init ========================
def _xavier_uniform(key, fan_in, fan_out):
    bound = math.sqrt(6.0 / (fan_in + fan_out))
    return jax.random.uniform(key, (fan_in, fan_out), jnp.float32, -bound, bound)


def _init_linear(key, d_in, d_out):
    # matches weights_init: xavier_uniform weight, zero bias.  Stored as (in, out) for x @ W.
    return _xavier_uniform(key, d_in, d_out), jnp.zeros((1, d_out), jnp.float32)


def init_params(key):
    keys = jax.random.split(key, 2 + NUM_LAYERS)
    params = {
        "embedding": jax.random.normal(keys[0], (VOCAB, D_MODEL), jnp.float32),
        "dec_ln_g": jnp.ones((1, D_MODEL), jnp.float32),
        "dec_ln_b": jnp.zeros((1, D_MODEL), jnp.float32),
    }
    fw, fb = _init_linear(keys[1], D_MODEL, VOCAB)
    params["final_w"], params["final_b"] = fw, fb

    layers = []
    for i in range(NUM_LAYERS):
        lk = jax.random.split(keys[2 + i], 7)
        p = {}
        for name, k_, din, dout in [
            ("wq", lk[0], D_MODEL, D_MODEL),
            ("wk", lk[1], D_MODEL, D_MODEL),
            ("wv", lk[2], D_MODEL, D_MODEL),
            ("dense", lk[3], D_MODEL, D_MODEL),
            ("glu1", lk[4], D_MODEL, DFF),
            ("glu2", lk[5], D_MODEL, DFF),
            ("glu3", lk[6], DFF, D_MODEL),
        ]:
            w, b = _init_linear(k_, din, dout)
            p[name + "_w"], p[name + "_b"] = w, b
        p["ln1_g"] = jnp.ones((1, D_MODEL), jnp.float32)
        p["ln1_b"] = jnp.zeros((1, D_MODEL), jnp.float32)
        p["ln2_g"] = jnp.ones((1, D_MODEL), jnp.float32)
        p["ln2_b"] = jnp.zeros((1, D_MODEL), jnp.float32)
        layers.append(p)
    params["layers"] = layers

    # v510Gi ablation: cached G (energy-curvature tensor) per layer = identity per head.
    gcache = jnp.tile(jnp.eye(DEPTH, dtype=jnp.float32)[None], (NUM_HEADS, 1, 1))
    gcachelst = [gcache for _ in range(NUM_LAYERS)]
    return params, gcachelst


# ==================================== main ========================================
if __name__ == "__main__":
    root = jax.random.PRNGKey(0)
    pkey, ikey = jax.random.split(root)
    params, gcachelst = init_params(pkey)

    # one-time host-side packing (kept out of the per-call jitted path)
    packed = pack_model(params, gcachelst)

    inp = jax.random.randint(ikey, (B, S), 0, VOCAB, dtype=jnp.int32)
    causal = np.triu(np.ones((S, S), np.float32), k=1)
    look_ahead_mask = np.broadcast_to(causal[None, None, :, :], (B, 1, S, S))
    additive_mask = prepare_attention_mask(look_ahead_mask)   # also one-time prep

    logits, dec_output, kvcachelst = pldr_model(inp, additive_mask, packed)

    jax.block_until_ready(logits)
    jax.block_until_ready(dec_output)
    jax.block_until_ready(kvcachelst)

    assert logits.shape == (B, S, VOCAB)
    assert dec_output.shape == (B, S, D_MODEL)
    assert len(kvcachelst) == NUM_LAYERS
    assert kvcachelst[0][0].shape == (B, S, NUM_HEADS, DEPTH)
    assert kvcachelst[0][1].shape == (B, S, NUM_HEADS, DEPTH)
    assert bool(jnp.all(jnp.isfinite(logits)))
    assert bool(jnp.all(jnp.isfinite(dec_output)))
    print("KERNEL_OK")
</pallas_src>

<mosaic_0001>
module attributes {stable_mosaic.version = 11 : i64} {
  func.func @kernel(%arg0: memref<16x1xi32, #tpu.memory_space<vmem>>, %arg1: memref<16x16xf32, #tpu.memory_space<vmem>>, %arg2: memref<48x128xf32, #tpu.memory_space<vmem>>, %arg3: memref<480x128xf32, #tpu.memory_space<vmem>>, %arg4: memref<24x128xf32, #tpu.memory_space<vmem>>, %arg5: memref<16x128xf32, #tpu.memory_space<vmem>>, %arg6: memref<16x32xf32, #tpu.memory_space<vmem>>, %arg7: memref<16x128xf32, #tpu.memory_space<vmem>>) attributes {dimension_semantics = [], scalar_prefetch = 0 : i64, scratch_operands = 0 : i64, tpu.core_type = #tpu.core_type<tc>} {
    %c0 = arith.constant 0 : index
    %c0_0 = arith.constant 0 : index
    %0 = vector.load %arg0[%c0, %c0_0] : memref<16x1xi32, #tpu.memory_space<vmem>>, vector<16x1xi32>
    %1 = tpu.iota {dimensions = array<i32: 1>} : vector<16x128xi32>
    %2 = vector.broadcast %0 : vector<16x1xi32> to vector<16x128xi32>
    %3 = arith.cmpi eq, %1, %2 : vector<16x128xi32>
    %4 = arith.extui %3 : vector<16x128xi1> to vector<16x128xi32>
    %5 = arith.sitofp %4 : vector<16x128xi32> to vector<16x128xf32>
    %c0_1 = arith.constant 0 : index
    %c0_2 = arith.constant 0 : index
    %6 = vector.load %arg3[%c0_1, %c0_2] : memref<480x128xf32, #tpu.memory_space<vmem>>, vector<128x32xf32>
    %cst = arith.constant dense<0.000000e+00> : vector<16x32xf32>
    %7 = tpu.matmul %5, %6, %cst {dimension_numbers = #tpu.dot_dimension_numbers<[1], [0], [0], [1], [0, 0, 1, 1], [], []>} : vector<16x128xf32>, vector<128x32xf32>, vector<16x32xf32> -> vector<16x32xf32>
    %c0_3 = arith.constant 0 : index
    %c0_4 = arith.constant 0 : index
    %8 = vector.load %arg4[%c0_3, %c0_4] : memref<24x128xf32, #tpu.memory_space<vmem>>, vector<1x32xf32>
    %c1 = arith.constant 1 : index
    %c0_5 = arith.constant 0 : index
    %9 = vector.load %arg4[%c1, %c0_5] : memref<24x128xf32, #tpu.memory_space<vmem>>, vector<1x32xf32>
    %cst_6 = arith.constant dense<0.000000e+00> : vector<16xf32>
    %10 = vector.multi_reduction <add>, %7, %cst_6 [1] : vector<16x32xf32> to vector<16xf32>
    %11 = vector.shape_cast %10 : vector<16xf32> to vector<16x1xf32>
    %cst_7 = arith.constant 3.200000e+01 : f32
    %12 = vector.broadcast %cst_7 : f32 to vector<16x1xf32>
    %13 = arith.divf %11, %12 : vector<16x1xf32>
    %14 = vector.broadcast %13 : vector<16x1xf32> to vector<16x32xf32>
    %15 = arith.subf %7, %14 : vector<16x32xf32>
    %16 = arith.mulf %15, %15 : vector<16x32xf32>
    %cst_8 = arith.constant dense<0.000000e+00> : vector<16xf32>
    %17 = vector.multi_reduction <add>, %16, %cst_8 [1] : vector<16x32xf32> to vector<16xf32>
    %18 = vector.shape_cast %17 : vector<16xf32> to vector<16x1xf32>
    %cst_9 = arith.constant 3.200000e+01 : f32
    %19 = vector.broadcast %cst_9 : f32 to vector<16x1xf32>
    %20 = arith.divf %18, %19 : vector<16x1xf32>
    %cst_10 = arith.constant 9.99999997E-7 : f32
    %21 = vector.broadcast %cst_10 : f32 to vector<16x1xf32>
    %22 = arith.addf %20, %21 : vector<16x1xf32>
    %23 = math.rsqrt %22 : vector<16x1xf32>
    %24 = vector.broadcast %23 : vector<16x1xf32> to vector<16x32xf32>
    %25 = arith.mulf %15, %24 : vector<16x32xf32>
    %26 = vector.broadcast %8 : vector<1x32xf32> to vector<16x32xf32>
    %27 = arith.mulf %25, %26 : vector<16x32xf32>
    %28 = vector.broadcast %9 : vector<1x32xf32> to vector<16x32xf32>
    %29 = arith.addf %27, %28 : vector<16x32xf32>
    %c0_11 = arith.constant 0 : index
    %c0_12 = arith.constant 0 : index
    %30 = vector.load %arg2[%c0_11, %c0_12] : memref<48x128xf32, #tpu.memory_space<vmem>>, vector<16x128xf32>
    %c16 = arith.constant 16 : index
    %c0_13 = arith.constant 0 : index
    %31 = vector.load %arg2[%c16, %c0_13] : memref<48x128xf32, #tpu.memory_space<vmem>>, vector<16x128xf32>
    %c32 = arith.constant 32 : index
    %c0_14 = arith.constant 0 : index
    %32 = vector.load %arg2[%c32, %c0_14] : memref<48x128xf32, #tpu.memory_space<vmem>>, vector<16x128xf32>
    %c0_15 = arith.constant 0 : index
    %c0_16 = arith.constant 0 : index
    %33 = vector.load %arg1[%c0_15, %c0_16] : memref<16x16xf32, #tpu.memory_space<vmem>>, vector<16x16xf32>
    %c160 = arith.constant 160 : index
    %c0_17 = arith.constant 0 : index
    %34 = vector.load %arg3[%c160, %c0_17] : memref<480x128xf32, #tpu.memory_space<vmem>>, vector<32x128xf32>
    %cst_18 = arith.constant dense<0.000000e+00> : vector<16x128xf32>
    %35 = tpu.matmul %29, %34, %cst_18 {dimension_numbers = #tpu.dot_dimension_numbers<[1], [0], [0], [1], [0, 0, 1, 1], [], []>} : vector<16x32xf32>, vector<32x128xf32>, vector<16x128xf32> -> vector<16x128xf32>
    %c8 = arith.constant 8 : index
    %c0_19 = arith.constant 0 : index
    %36 = vector.load %arg4[%c8, %c0_19] : memref<24x128xf32, #tpu.memory_space<vmem>>, vector<1x128xf32>
    %37 = vector.broadcast %36 : vector<1x128xf32> to vector<16x128xf32>
    %38 = arith.addf %35, %37 : vector<16x128xf32>
    %c127_i32 = arith.constant 127 : i32
    %39 = tpu.dynamic_rotate %38 by %c127_i32 dim 1 : vector<16x128xf32>, i32 -> vector<16x128xf32>
    %c1_i32 = arith.constant 1 : i32
    %40 = tpu.dynamic_rotate %38 by %c1_i32 dim 1 : vector<16x128xf32>, i32 -> vector<16x128xf32>
    %41 = arith.mulf %38, %30 : vector<16x128xf32>
    %42 = arith.mulf %39, %31 : vector<16x128xf32>
    %43 = arith.addf %41, %42 : vector<16x128xf32>
    %44 = arith.mulf %40, %32 : vector<16x128xf32>
    %45 = arith.addf %43, %44 : vector<16x128xf32>
    %46 = vector.extract_strided_slice %45 {offsets = [0, 0], sizes = [16, 32], strides = [1, 1]} : vector<16x128xf32> to vector<16x32xf32>
    %47 = vector.extract_strided_slice %45 {offsets = [0, 32], sizes = [16, 32], strides = [1, 1]} : vector<16x128xf32> to vector<16x32xf32>
    %48 = vector.extract_strided_slice %38 {offsets = [0, 64], sizes = [16, 32], strides = [1, 1]} : vector<16x128xf32> to vector<16x32xf32>
    %c0_20 = arith.constant 0 : index
    %c0_21 = arith.constant 0 : index
    %49 = vector.load %arg7[%c0_20, %c0_21] : memref<16x128xf32, #tpu.memory_space<vmem>>, vector<16x32xf32>
    tpu.vector_store %arg7[%c0_20, %c0_21], %47 {strides = array<i32>} : memref<16x128xf32, #tpu.memory_space<vmem>>, vector<16x32xf32>,
    %c0_22 = arith.constant 0 : index
    %c32_23 = arith.constant 32 : index
    %50 = vector.load %arg7[%c0_22, %c32_23] : memref<16x128xf32, #tpu.memory_space<vmem>>, vector<16x32xf32>
    tpu.vector_store %arg7[%c0_22, %c32_23], %48 {strides = array<i32>} : memref<16x128xf32, #tpu.memory_space<vmem>>, vector<16x32xf32>,
    %51 = vector.extract_strided_slice %46 {offsets = [0, 0], sizes = [16, 8], strides = [1, 1]} : vector<16x32xf32> to vector<16x8xf32>
    %52 = vector.extract_strided_slice %47 {offsets = [0, 0], sizes = [16, 8], strides = [1, 1]} : vector<16x32xf32> to vector<16x8xf32>
    %53 = vector.extract_strided_slice %48 {offsets = [0, 0], sizes = [16, 8], strides = [1, 1]} : vector<16x32xf32> to vector<16x8xf32>
    %cst_24 = arith.constant dense<0.000000e+00> : vector<16x16xf32>
    %54 = tpu.matmul %51, %52, %cst_24 {dimension_numbers = #tpu.dot_dimension_numbers<[1], [1], [0], [0], [0, 0, 1, 0], [], []>} : vector<16x8xf32>, vector<16x8xf32>, vector<16x16xf32> -> vector<16x16xf32>
    %cst_25 = arith.constant 0.353553385 : f32
    %55 = vector.broadcast %cst_25 : f32 to vector<16x16xf32>
    %56 = arith.mulf %54, %55 : vector<16x16xf32>
    %57 = arith.addf %56, %33 : vector<16x16xf32>
    %cst_26 = arith.constant dense<0xFF800000> : vector<16xf32>
    %58 = vector.multi_reduction <maximumf>, %57, %cst_26 [1] : vector<16x16xf32> to vector<16xf32>
    %59 = vector.shape_cast %58 : vector<16xf32> to vector<16x1xf32>
    %60 = vector.broadcast %59 : vector<16x1xf32> to vector<16x16xf32>
    %61 = arith.subf %57, %60 : vector<16x16xf32>
    %62 = math.exp %61 : vector<16x16xf32>
    %cst_27 = arith.constant dense<0.000000e+00> : vector<16xf32>
    %63 = vector.multi_reduction <add>, %62, %cst_27 [1] : vector<16x16xf32> to vector<16xf32>
    %64 = vector.shape_cast %63 : vector<16xf32> to vector<16x1xf32>
    %65 = tpu.reciprocal %64 {approx = true} : vector<16x1xf32> -> vector<16x1xf32>
    %66 = vector.broadcast %65 : vector<16x1xf32> to vector<16x16xf32>
    %67 = arith.mulf %62, %66 : vector<16x16xf32>
    %cst_28 = arith.constant dense<0.000000e+00> : vector<16x8xf32>
    %68 = tpu.matmul %67, %53, %cst_28 {dimension_numbers = #tpu.dot_dimension_numbers<[1], [0], [0], [1], [0, 0, 1, 1], [], []>} : vector<16x16xf32>, vector<16x8xf32>, vector<16x8xf32> -> vector<16x8xf32>
    %69 = vector.extract_strided_slice %46 {offsets = [0, 8], sizes = [16, 8], strides = [1, 1]} : vector<16x32xf32> to vector<16x8xf32>
    %70 = vector.extract_strided_slice %47 {offsets = [0, 8], sizes = [16, 8], strides = [1, 1]} : vector<16x32xf32> to vector<16x8xf32>
    %71 = vector.extract_strided_slice %48 {offsets = [0, 8], sizes = [16, 8], strides = [1, 1]} : vector<16x32xf32> to vector<16x8xf32>
    %cst_29 = arith.constant dense<0.000000e+00> : vector<16x16xf32>
    %72 = tpu.matmul %69, %70, %cst_29 {dimension_numbers = #tpu.dot_dimension_numbers<[1], [1], [0], [0], [0, 0, 1, 0], [], []>} : vector<16x8xf32>, vector<16x8xf32>, vector<16x16xf32> -> vector<16x16xf32>
    %cst_30 = arith.constant 0.353553385 : f32
    %73 = vector.broadcast %cst_30 : f32 to vector<16x16xf32>
    %74 = arith.mulf %72, %73 : vector<16x16xf32>
    %75 = arith.addf %74, %33 : vector<16x16xf32>
    %cst_31 = arith.constant dense<0xFF800000> : vector<16xf32>
    %76 = vector.multi_reduction <maximumf>, %75, %cst_31 [1] : vector<16x16xf32> to vector<16xf32>
    %77 = vector.shape_cast %76 : vector<16xf32> to vector<16x1xf32>
    %78 = vector.broadcast %77 : vector<16x1xf32> to vector<16x16xf32>
    %79 = arith.subf %75, %78 : vector<16x16xf32>
    %80 = math.exp %79 : vector<16x16xf32>
    %cst_32 = arith.constant dense<0.000000e+00> : vector<16xf32>
    %81 = vector.multi_reduction <add>, %80, %cst_32 [1] : vector<16x16xf32> to vector<16xf32>
    %82 = vector.shape_cast %81 : vector<16xf32> to vector<16x1xf32>
    %83 = tpu.reciprocal %82 {approx = true} : vector<16x1xf32> -> vector<16x1xf32>
    %84 = vector.broadcast %83 : vector<16x1xf32> to vector<16x16xf32>
    %85 = arith.mulf %80, %84 : vector<16x16xf32>
    %cst_33 = arith.constant dense<0.000000e+00> : vector<16x8xf32>
    %86 = tpu.matmul %85, %71, %cst_33 {dimension_numbers = #tpu.dot_dimension_numbers<[1], [0], [0], [1], [0, 0, 1, 1], [], []>} : vector<16x16xf32>, vector<16x8xf32>, vector<16x8xf32> -> vector<16x8xf32>
    %87 = vector.extract_strided_slice %46 {offsets = [0, 16], sizes = [16, 8], strides = [1, 1]} : vector<16x32xf32> to vector<16x8xf32>
    %88 = vector.extract_strided_slice %47 {offsets = [0, 16], sizes = [16, 8], strides = [1, 1]} : vector<16x32xf32> to vector<16x8xf32>
    %89 = vector.extract_strided_slice %48 {offsets = [0, 16], sizes = [16, 8], strides = [1, 1]} : vector<16x32xf32> to vector<16x8xf32>
    %cst_34 = arith.constant dense<0.000000e+00> : vector<16x16xf32>
    %90 = tpu.matmul %87, %88, %cst_34 {dimension_numbers = #tpu.dot_dimension_numbers<[1], [1], [0], [0], [0, 0, 1, 0], [], []>} : vector<16x8xf32>, vector<16x8xf32>, vector<16x16xf32> -> vector<16x16xf32>
    %cst_35 = arith.constant 0.353553385 : f32
    %91 = vector.broadcast %cst_35 : f32 to vector<16x16xf32>
    %92 = arith.mulf %90, %91 : vector<16x16xf32>
    %93 = arith.addf %92, %33 : vector<16x16xf32>
    %cst_36 = arith.constant dense<0xFF800000> : vector<16xf32>
    %94 = vector.multi_reduction <maximumf>, %93, %cst_36 [1] : vector<16x16xf32> to vector<16xf32>
    %95 = vector.shape_cast %94 : vector<16xf32> to vector<16x1xf32>
    %96 = vector.broadcast %95 : vector<16x1xf32> to vector<16x16xf32>
    %97 = arith.subf %93, %96 : vector<16x16xf32>
    %98 = math.exp %97 : vector<16x16xf32>
    %cst_37 = arith.constant dense<0.000000e+00> : vector<16xf32>
    %99 = vector.multi_reduction <add>, %98, %cst_37 [1] : vector<16x16xf32> to vector<16xf32>
    %100 = vector.shape_cast %99 : vector<16xf32> to vector<16x1xf32>
    %101 = tpu.reciprocal %100 {approx = true} : vector<16x1xf32> -> vector<16x1xf32>
    %102 = vector.broadcast %101 : vector<16x1xf32> to vector<16x16xf32>
    %103 = arith.mulf %98, %102 : vector<16x16xf32>
    %cst_38 = arith.constant dense<0.000000e+00> : vector<16x8xf32>
    %104 = tpu.matmul %103, %89, %cst_38 {dimension_numbers = #tpu.dot_dimension_numbers<[1], [0], [0], [1], [0, 0, 1, 1], [], []>} : vector<16x16xf32>, vector<16x8xf32>, vector<16x8xf32> -> vector<16x8xf32>
    %105 = vector.extract_strided_slice %46 {offsets = [0, 24], sizes = [16, 8], strides = [1, 1]} : vector<16x32xf32> to vector<16x8xf32>
    %106 = vector.extract_strided_slice %47 {offsets = [0, 24], sizes = [16, 8], strides = [1, 1]} : vector<16x32xf32> to vector<16x8xf32>
    %107 = vector.extract_strided_slice %48 {offsets = [0, 24], sizes = [16, 8], strides = [1, 1]} : vector<16x32xf32> to vector<16x8xf32>
    %cst_39 = arith.constant dense<0.000000e+00> : vector<16x16xf32>
    %108 = tpu.matmul %105, %106, %cst_39 {dimension_numbers = #tpu.dot_dimension_numbers<[1], [1], [0], [0], [0, 0, 1, 0], [], []>} : vector<16x8xf32>, vector<16x8xf32>, vector<16x16xf32> -> vector<16x16xf32>
    %cst_40 = arith.constant 0.353553385 : f32
    %109 = vector.broadcast %cst_40 : f32 to vector<16x16xf32>
    %110 = arith.mulf %108, %109 : vector<16x16xf32>
    %111 = arith.addf %110, %33 : vector<16x16xf32>
    %cst_41 = arith.constant dense<0xFF800000> : vector<16xf32>
    %112 = vector.multi_reduction <maximumf>, %111, %cst_41 [1] : vector<16x16xf32> to vector<16xf32>
    %113 = vector.shape_cast %112 : vector<16xf32> to vector<16x1xf32>
    %114 = vector.broadcast %113 : vector<16x1xf32> to vector<16x16xf32>
    %115 = arith.subf %111, %114 : vector<16x16xf32>
    %116 = math.exp %115 : vector<16x16xf32>
    %cst_42 = arith.constant dense<0.000000e+00> : vector<16xf32>
    %117 = vector.multi_reduction <add>, %116, %cst_42 [1] : vector<16x16xf32> to vector<16xf32>
    %118 = vector.shape_cast %117 : vector<16xf32> to vector<16x1xf32>
    %119 = tpu.reciprocal %118 {approx = true} : vector<16x1xf32> -> vector<16x1xf32>
    %120 = vector.broadcast %119 : vector<16x1xf32> to vector<16x16xf32>
    %121 = arith.mulf %116, %120 : vector<16x16xf32>
    %cst_43 = arith.constant dense<0.000000e+00> : vector<16x8xf32>
    %122 = tpu.matmul %121, %107, %cst_43 {dimension_numbers = #tpu.dot_dimension_numbers<[1], [0], [0], [1], [0, 0, 1, 1], [], []>} : vector<16x16xf32>, vector<16x8xf32>, vector<16x8xf32> -> vector<16x8xf32>
    %123 = tpu.concatenate %68, %86, %104, %122 in 1 : vector<16x8xf32>, vector<16x8xf32>, vector<16x8xf32>, vector<16x8xf32> -> vector<16x32xf32>
    %c224 = arith.constant 224 : index
    %c32_44 = arith.constant 32 : index
    %124 = vector.load %arg3[%c224, %c32_44] : memref<480x128xf32, #tpu.memory_space<vmem>>, vector<32x32xf32>
    %cst_45 = arith.constant dense<0.000000e+00> : vector<16x32xf32>
    %125 = tpu.matmul %123, %124, %cst_45 {dimension_numbers = #tpu.dot_dimension_numbers<[1], [0], [0], [1], [0, 0, 1, 1], [], []>} : vector<16x32xf32>, vector<32x32xf32>, vector<16x32xf32> -> vector<16x32xf32>
    %c10 = arith.constant 10 : index
    %c0_46 = arith.constant 0 : index
    %126 = vector.load %arg4[%c10, %c0_46] : memref<24x128xf32, #tpu.memory_space<vmem>>, vector<1x32xf32>
    %127 = vector.broadcast %126 : vector<1x32xf32> to vector<16x32xf32>
    %128 = arith.addf %125, %127 : vector<16x32xf32>
    %129 = arith.addf %128, %29 : vector<16x32xf32>
    %c12 = arith.constant 12 : index
    %c0_47 = arith.constant 0 : index
    %130 = vector.load %arg4[%c12, %c0_47] : memref<24x128xf32, #tpu.memory_space<vmem>>, vector<1x32xf32>
    %c13 = arith.constant 13 : index
    %c0_48 = arith.constant 0 : index
    %131 = vector.load %arg4[%c13, %c0_48] : memref<24x128xf32, #tpu.memory_space<vmem>>, vector<1x32xf32>
    %cst_49 = arith.constant dense<0.000000e+00> : vector<16xf32>
    %132 = vector.multi_reduction <add>, %129, %cst_49 [1] : vector<16x32xf32> to vector<16xf32>
    %133 = vector.shape_cast %132 : vector<16xf32> to vector<16x1xf32>
    %cst_50 = arith.constant 3.200000e+01 : f32
    %134 = vector.broadcast %cst_50 : f32 to vector<16x1xf32>
    %135 = arith.divf %133, %134 : vector<16x1xf32>
    %136 = vector.broadcast %135 : vector<16x1xf32> to vector<16x32xf32>
    %137 = arith.subf %129, %136 : vector<16x32xf32>
    %138 = arith.mulf %137, %137 : vector<16x32xf32>
    %cst_51 = arith.constant dense<0.000000e+00> : vector<16xf32>
    %139 = vector.multi_reduction <add>, %138, %cst_51 [1] : vector<16x32xf32> to vector<16xf32>
    %140 = vector.shape_cast %139 : vector<16xf32> to vector<16x1xf32>
    %cst_52 = arith.constant 3.200000e+01 : f32
    %141 = vector.broadcast %cst_52 : f32 to vector<16x1xf32>
    %142 = arith.divf %140, %141 : vector<16x1xf32>
    %cst_53 = arith.constant 9.99999997E-7 : f32
    %143 = vector.broadcast %cst_53 : f32 to vector<16x1xf32>
    %144 = arith.addf %142, %143 : vector<16x1xf32>
    %145 = math.rsqrt %144 : vector<16x1xf32>
    %146 = vector.broadcast %145 : vector<16x1xf32> to vector<16x32xf32>
    %147 = arith.mulf %137, %146 : vector<16x32xf32>
    %148 = vector.broadcast %130 : vector<1x32xf32> to vector<16x32xf32>
    %149 = arith.mulf %147, %148 : vector<16x32xf32>
    %150 = vector.broadcast %131 : vector<1x32xf32> to vector<16x32xf32>
    %151 = arith.addf %149, %150 : vector<16x32xf32>
    %c192 = arith.constant 192 : index
    %c0_54 = arith.constant 0 : index
    %152 = vector.load %arg3[%c192, %c0_54] : memref<480x128xf32, #tpu.memory_space<vmem>>, vector<32x128xf32>
    %cst_55 = arith.constant dense<0.000000e+00> : vector<16x128xf32>
    %153 = tpu.matmul %151, %152, %cst_55 {dimension_numbers = #tpu.dot_dimension_numbers<[1], [0], [0], [1], [0, 0, 1, 1], [], []>} : vector<16x32xf32>, vector<32x128xf32>, vector<16x128xf32> -> vector<16x128xf32>
    %c9 = arith.constant 9 : index
    %c0_56 = arith.constant 0 : index
    %154 = vector.load %arg4[%c9, %c0_56] : memref<24x128xf32, #tpu.memory_space<vmem>>, vector<1x128xf32>
    %155 = vector.broadcast %154 : vector<1x128xf32> to vector<16x128xf32>
    %156 = arith.addf %153, %155 : vector<16x128xf32>
    %157 = vector.extract_strided_slice %156 {offsets = [0, 0], sizes = [16, 64], strides = [1, 1]} : vector<16x128xf32> to vector<16x64xf32>
    %158 = vector.extract_strided_slice %156 {offsets = [0, 64], sizes = [16, 64], strides = [1, 1]} : vector<16x128xf32> to vector<16x64xf32>
    %159 = arith.negf %157 : vector<16x64xf32>
    %160 = math.exp %159 : vector<16x64xf32>
    %cst_57 = arith.constant 1.000000e+00 : f32
    %161 = vector.broadcast %cst_57 : f32 to vector<16x64xf32>
    %162 = arith.addf %161, %160 : vector<16x64xf32>
    %163 = arith.divf %161, %162 : vector<16x64xf32>
    %164 = arith.mulf %157, %163 : vector<16x64xf32>
    %165 = arith.mulf %164, %158 : vector<16x64xf32>
    %c256 = arith.constant 256 : index
    %c0_58 = arith.constant 0 : index
    %166 = vector.load %arg3[%c256, %c0_58] : memref<480x128xf32, #tpu.memory_space<vmem>>, vector<64x32xf32>
    %cst_59 = arith.constant dense<0.000000e+00> : vector<16x32xf32>
    %167 = tpu.matmul %165, %166, %cst_59 {dimension_numbers = #tpu.dot_dimension_numbers<[1], [0], [0], [1], [0, 0, 1, 1], [], []>} : vector<16x64xf32>, vector<64x32xf32>, vector<16x32xf32> -> vector<16x32xf32>
    %c11 = arith.constant 11 : index
    %c0_60 = arith.constant 0 : index
    %168 = vector.load %arg4[%c11, %c0_60] : memref<24x128xf32, #tpu.memory_space<vmem>>, vector<1x32xf32>
    %169 = vector.broadcast %168 : vector<1x32xf32> to vector<16x32xf32>
    %170 = arith.addf %167, %169 : vector<16x32xf32>
    %171 = arith.addf %170, %151 : vector<16x32xf32>
    %c14 = arith.constant 14 : index
    %c0_61 = arith.constant 0 : index
    %172 = vector.load %arg4[%c14, %c0_61] : memref<24x128xf32, #tpu.memory_space<vmem>>, vector<1x32xf32>
    %c15 = arith.constant 15 : index
    %c0_62 = arith.constant 0 : index
    %173 = vector.load %arg4[%c15, %c0_62] : memref<24x128xf32, #tpu.memory_space<vmem>>, vector<1x32xf32>
    %cst_63 = arith.constant dense<0.000000e+00> : vector<16xf32>
    %174 = vector.multi_reduction <add>, %171, %cst_63 [1] : vector<16x32xf32> to vector<16xf32>
    %175 = vector.shape_cast %174 : vector<16xf32> to vector<16x1xf32>
    %cst_64 = arith.constant 3.200000e+01 : f32
    %176 = vector.broadcast %cst_64 : f32 to vector<16x1xf32>
    %177 = arith.divf %175, %176 : vector<16x1xf32>
    %178 = vector.broadcast %177 : vector<16x1xf32> to vector<16x32xf32>
    %179 = arith.subf %171, %178 : vector<16x32xf32>
    %180 = arith.mulf %179, %179 : vector<16x32xf32>
    %cst_65 = arith.constant dense<0.000000e+00> : vector<16xf32>
    %181 = vector.multi_reduction <add>, %180, %cst_65 [1] : vector<16x32xf32> to vector<16xf32>
    %182 = vector.shape_cast %181 : vector<16xf32> to vector<16x1xf32>
    %cst_66 = arith.constant 3.200000e+01 : f32
    %183 = vector.broadcast %cst_66 : f32 to vector<16x1xf32>
    %184 = arith.divf %182, %183 : vector<16x1xf32>
    %cst_67 = arith.constant 9.99999997E-7 : f32
    %185 = vector.broadcast %cst_67 : f32 to vector<16x1xf32>
    %186 = arith.addf %184, %185 : vector<16x1xf32>
    %187 = math.rsqrt %186 : vector<16x1xf32>
    %188 = vector.broadcast %187 : vector<16x1xf32> to vector<16x32xf32>
    %189 = arith.mulf %179, %188 : vector<16x32xf32>
    %190 = vector.broadcast %172 : vector<1x32xf32> to vector<16x32xf32>
    %191 = arith.mulf %189, %190 : vector<16x32xf32>
    %192 = vector.broadcast %173 : vector<1x32xf32> to vector<16x32xf32>
    %193 = arith.addf %191, %192 : vector<16x32xf32>
    %c320 = arith.constant 320 : index
    %c0_68 = arith.constant 0 : index
    %194 = vector.load %arg3[%c320, %c0_68] : memref<480x128xf32, #tpu.memory_space<vmem>>, vector<32x128xf32>
    %cst_69 = arith.constant dense<0.000000e+00> : vector<16x128xf32>
    %195 = tpu.matmul %193, %194, %cst_69 {dimension_numbers = #tpu.dot_dimension_numbers<[1], [0], [0], [1], [0, 0, 1, 1], [], []>} : vector<16x32xf32>, vector<32x128xf32>, vector<16x128xf32> -> vector<16x128xf32>
    %c16_70 = arith.constant 16 : index
    %c0_71 = arith.constant 0 : index
    %196 = vector.load %arg4[%c16_70, %c0_71] : memref<24x128xf32, #tpu.memory_space<vmem>>, vector<1x128xf32>
    %197 = vector.broadcast %196 : vector<1x128xf32> to vector<16x128xf32>
    %198 = arith.addf %195, %197 : vector<16x128xf32>
    %c127_i32_72 = arith.constant 127 : i32
    %199 = tpu.dynamic_rotate %198 by %c127_i32_72 dim 1 : vector<16x128xf32>, i32 -> vector<16x128xf32>
    %c1_i32_73 = arith.constant 1 : i32
    %200 = tpu.dynamic_rotate %198 by %c1_i32_73 dim 1 : vector<16x128xf32>, i32 -> vector<16x128xf32>
    %201 = arith.mulf %198, %30 : vector<16x128xf32>
    %202 = arith.mulf %199, %31 : vector<16x128xf32>
    %203 = arith.addf %201, %202 : vector<16x128xf32>
    %204 = arith.mulf %200, %32 : vector<16x128xf32>
    %205 = arith.addf %203, %204 : vector<16x128xf32>
    %206 = vector.extract_strided_slice %205 {offsets = [0, 0], sizes = [16, 32], strides = [1, 1]} : vector<16x128xf32> to vector<16x32xf32>
    %207 = vector.extract_strided_slice %205 {offsets = [0, 32], sizes = [16, 32], strides = [1, 1]} : vector<16x128xf32> to vector<16x32xf32>
    %208 = vector.extract_strided_slice %198 {offsets = [0, 64], sizes = [16, 32], strides = [1, 1]} : vector<16x128xf32> to vector<16x32xf32>
    %c0_74 = arith.constant 0 : index
    %c64 = arith.constant 64 : index
    %209 = vector.load %arg7[%c0_74, %c64] : memref<16x128xf32, #tpu.memory_space<vmem>>, vector<16x32xf32>
    tpu.vector_store %arg7[%c0_74, %c64], %207 {strides = array<i32>} : memref<16x128xf32, #tpu.memory_space<vmem>>, vector<16x32xf32>,
    %c0_75 = arith.constant 0 : index
    %c96 = arith.constant 96 : index
    %210 = vector.load %arg7[%c0_75, %c96] : memref<16x128xf32, #tpu.memory_space<vmem>>, vector<16x32xf32>
    tpu.vector_store %arg7[%c0_75, %c96], %208 {strides = array<i32>} : memref<16x128xf32, #tpu.memory_space<vmem>>, vector<16x32xf32>,
    %211 = vector.extract_strided_slice %206 {offsets = [0, 0], sizes = [16, 8], strides = [1, 1]} : vector<16x32xf32> to vector<16x8xf32>
    %212 = vector.extract_strided_slice %207 {offsets = [0, 0], sizes = [16, 8], strides = [1, 1]} : vector<16x32xf32> to vector<16x8xf32>
    %213 = vector.extract_strided_slice %208 {offsets = [0, 0], sizes = [16, 8], strides = [1, 1]} : vector<16x32xf32> to vector<16x8xf32>
    %cst_76 = arith.constant dense<0.000000e+00> : vector<16x16xf32>
    %214 = tpu.matmul %211, %212, %cst_76 {dimension_numbers = #tpu.dot_dimension_numbers<[1], [1], [0], [0], [0, 0, 1, 0], [], []>} : vector<16x8xf32>, vector<16x8xf32>, vector<16x16xf32> -> vector<16x16xf32>
    %cst_77 = arith.constant 0.353553385 : f32
    %215 = vector.broadcast %cst_77 : f32 to vector<16x16xf32>
    %216 = arith.mulf %214, %215 : vector<16x16xf32>
    %217 = arith.addf %216, %33 : vector<16x16xf32>
    %cst_78 = arith.constant dense<0xFF800000> : vector<16xf32>
    %218 = vector.multi_reduction <maximumf>, %217, %cst_78 [1] : vector<16x16xf32> to vector<16xf32>
    %219 = vector.shape_cast %218 : vector<16xf32> to vector<16x1xf32>
    %220 = vector.broadcast %219 : vector<16x1xf32> to vector<16x16xf32>
    %221 = arith.subf %217, %220 : vector<16x16xf32>
    %222 = math.exp %221 : vector<16x16xf32>
    %cst_79 = arith.constant dense<0.000000e+00> : vector<16xf32>
    %223 = vector.multi_reduction <add>, %222, %cst_79 [1] : vector<16x16xf32> to vector<16xf32>
    %224 = vector.shape_cast %223 : vector<16xf32> to vector<16x1xf32>
    %225 = tpu.reciprocal %224 {approx = true} : vector<16x1xf32> -> vector<16x1xf32>
    %226 = vector.broadcast %225 : vector<16x1xf32> to vector<16x16xf32>
    %227 = arith.mulf %222, %226 : vector<16x16xf32>
    %cst_80 = arith.constant dense<0.000000e+00> : vector<16x8xf32>
    %228 = tpu.matmul %227, %213, %cst_80 {dimension_numbers = #tpu.dot_dimension_numbers<[1], [0], [0], [1], [0, 0, 1, 1], [], []>} : vector<16x16xf32>, vector<16x8xf32>, vector<16x8xf32> -> vector<16x8xf32>
    %229 = vector.extract_strided_slice %206 {offsets = [0, 8], sizes = [16, 8], strides = [1, 1]} : vector<16x32xf32> to vector<16x8xf32>
    %230 = vector.extract_strided_slice %207 {offsets = [0, 8], sizes = [16, 8], strides = [1, 1]} : vector<16x32xf32> to vector<16x8xf32>
    %231 = vector.extract_strided_slice %208 {offsets = [0, 8], sizes = [16, 8], strides = [1, 1]} : vector<16x32xf32> to vector<16x8xf32>
    %cst_81 = arith.constant dense<0.000000e+00> : vector<16x16xf32>
    %232 = tpu.matmul %229, %230, %cst_81 {dimension_numbers = #tpu.dot_dimension_numbers<[1], [1], [0], [0], [0, 0, 1, 0], [], []>} : vector<16x8xf32>, vector<16x8xf32>, vector<16x16xf32> -> vector<16x16xf32>
    %cst_82 = arith.constant 0.353553385 : f32
    %233 = vector.broadcast %cst_82 : f32 to vector<16x16xf32>
    %234 = arith.mulf %232, %233 : vector<16x16xf32>
    %235 = arith.addf %234, %33 : vector<16x16xf32>
    %cst_83 = arith.constant dense<0xFF800000> : vector<16xf32>
    %236 = vector.multi_reduction <maximumf>, %235, %cst_83 [1] : vector<16x16xf32> to vector<16xf32>
    %237 = vector.shape_cast %236 : vector<16xf32> to vector<16x1xf32>
    %238 = vector.broadcast %237 : vector<16x1xf32> to vector<16x16xf32>
    %239 = arith.subf %235, %238 : vector<16x16xf32>
    %240 = math.exp %239 : vector<16x16xf32>
    %cst_84 = arith.constant dense<0.000000e+00> : vector<16xf32>
    %241 = vector.multi_reduction <add>, %240, %cst_84 [1] : vector<16x16xf32> to vector<16xf32>
    %242 = vector.shape_cast %241 : vector<16xf32> to vector<16x1xf32>
    %243 = tpu.reciprocal %242 {approx = true} : vector<16x1xf32> -> vector<16x1xf32>
    %244 = vector.broadcast %243 : vector<16x1xf32> to vector<16x16xf32>
    %245 = arith.mulf %240, %244 : vector<16x16xf32>
    %cst_85 = arith.constant dense<0.000000e+00> : vector<16x8xf32>
    %246 = tpu.matmul %245, %231, %cst_85 {dimension_numbers = #tpu.dot_dimension_numbers<[1], [0], [0], [1], [0, 0, 1, 1], [], []>} : vector<16x16xf32>, vector<16x8xf32>, vector<16x8xf32> -> vector<16x8xf32>
    %247 = vector.extract_strided_slice %206 {offsets = [0, 16], sizes = [16, 8], strides = [1, 1]} : vector<16x32xf32> to vector<16x8xf32>
    %248 = vector.extract_strided_slice %207 {offsets = [0, 16], sizes = [16, 8], strides = [1, 1]} : vector<16x32xf32> to vector<16x8xf32>
    %249 = vector.extract_strided_slice %208 {offsets = [0, 16], sizes = [16, 8], strides = [1, 1]} : vector<16x32xf32> to vector<16x8xf32>
    %cst_86 = arith.constant dense<0.000000e+00> : vector<16x16xf32>
    %250 = tpu.matmul %247, %248, %cst_86 {dimension_numbers = #tpu.dot_dimension_numbers<[1], [1], [0], [0], [0, 0, 1, 0], [], []>} : vector<16x8xf32>, vector<16x8xf32>, vector<16x16xf32> -> vector<16x16xf32>
    %cst_87 = arith.constant 0.353553385 : f32
    %251 = vector.broadcast %cst_87 : f32 to vector<16x16xf32>
    %252 = arith.mulf %250, %251 : vector<16x16xf32>
    %253 = arith.addf %252, %33 : vector<16x16xf32>
    %cst_88 = arith.constant dense<0xFF800000> : vector<16xf32>
    %254 = vector.multi_reduction <maximumf>, %253, %cst_88 [1] : vector<16x16xf32> to vector<16xf32>
    %255 = vector.shape_cast %254 : vector<16xf32> to vector<16x1xf32>
    %256 = vector.broadcast %255 : vector<16x1xf32> to vector<16x16xf32>
    %257 = arith.subf %253, %256 : vector<16x16xf32>
    %258 = math.exp %257 : vector<16x16xf32>
    %cst_89 = arith.constant dense<0.000000e+00> : vector<16xf32>
    %259 = vector.multi_reduction <add>, %258, %cst_89 [1] : vector<16x16xf32> to vector<16xf32>
    %260 = vector.shape_cast %259 : vector<16xf32> to vector<16x1xf32>
    %261 = tpu.reciprocal %260 {approx = true} : vector<16x1xf32> -> vector<16x1xf32>
    %262 = vector.broadcast %261 : vector<16x1xf32> to vector<16x16xf32>
    %263 = arith.mulf %258, %262 : vector<16x16xf32>
    %cst_90 = arith.constant dense<0.000000e+00> : vector<16x8xf32>
    %264 = tpu.matmul %263, %249, %cst_90 {dimension_numbers = #tpu.dot_dimension_numbers<[1], [0], [0], [1], [0, 0, 1, 1], [], []>} : vector<16x16xf32>, vector<16x8xf32>, vector<16x8xf32> -> vector<16x8xf32>
    %265 = vector.extract_strided_slice %206 {offsets = [0, 24], sizes = [16, 8], strides = [1, 1]} : vector<16x32xf32> to vector<16x8xf32>
    %266 = vector.extract_strided_slice %207 {offsets = [0, 24], sizes = [16, 8], strides = [1, 1]} : vector<16x32xf32> to vector<16x8xf32>
    %267 = vector.extract_strided_slice %208 {offsets = [0, 24], sizes = [16, 8], strides = [1, 1]} : vector<16x32xf32> to vector<16x8xf32>
    %cst_91 = arith.constant dense<0.000000e+00> : vector<16x16xf32>
    %268 = tpu.matmul %265, %266, %cst_91 {dimension_numbers = #tpu.dot_dimension_numbers<[1], [1], [0], [0], [0, 0, 1, 0], [], []>} : vector<16x8xf32>, vector<16x8xf32>, vector<16x16xf32> -> vector<16x16xf32>
    %cst_92 = arith.constant 0.353553385 : f32
    %269 = vector.broadcast %cst_92 : f32 to vector<16x16xf32>
    %270 = arith.mulf %268, %269 : vector<16x16xf32>
    %271 = arith.addf %270, %33 : vector<16x16xf32>
    %cst_93 = arith.constant dense<0xFF800000> : vector<16xf32>
    %272 = vector.multi_reduction <maximumf>, %271, %cst_93 [1] : vector<16x16xf32> to vector<16xf32>
    %273 = vector.shape_cast %272 : vector<16xf32> to vector<16x1xf32>
    %274 = vector.broadcast %273 : vector<16x1xf32> to vector<16x16xf32>
    %275 = arith.subf %271, %274 : vector<16x16xf32>
    %276 = math.exp %275 : vector<16x16xf32>
    %cst_94 = arith.constant dense<0.000000e+00> : vector<16xf32>
    %277 = vector.multi_reduction <add>, %276, %cst_94 [1] : vector<16x16xf32> to vector<16xf32>
    %278 = vector.shape_cast %277 : vector<16xf32> to vector<16x1xf32>
    %279 = tpu.reciprocal %278 {approx = true} : vector<16x1xf32> -> vector<16x1xf32>
    %280 = vector.broadcast %279 : vector<16x1xf32> to vector<16x16xf32>
    %281 = arith.mulf %276, %280 : vector<16x16xf32>
    %cst_95 = arith.constant dense<0.000000e+00> : vector<16x8xf32>
    %282 = tpu.matmul %281, %267, %cst_95 {dimension_numbers = #tpu.dot_dimension_numbers<[1], [0], [0], [1], [0, 0, 1, 1], [], []>} : vector<16x16xf32>, vector<16x8xf32>, vector<16x8xf32> -> vector<16x8xf32>
    %283 = tpu.concatenate %228, %246, %264, %282 in 1 : vector<16x8xf32>, vector<16x8xf32>, vector<16x8xf32>, vector<16x8xf32> -> vector<16x32xf32>
    %c384 = arith.constant 384 : index
    %c32_96 = arith.constant 32 : index
    %284 = vector.load %arg3[%c384, %c32_96] : memref<480x128xf32, #tpu.memory_space<vmem>>, vector<32x32xf32>
    %cst_97 = arith.constant dense<0.000000e+00> : vector<16x32xf32>
    %285 = tpu.matmul %283, %284, %cst_97 {dimension_numbers = #tpu.dot_dimension_numbers<[1], [0], [0], [1], [0, 0, 1, 1], [], []>} : vector<16x32xf32>, vector<32x32xf32>, vector<16x32xf32> -> vector<16x32xf32>
    %c18 = arith.constant 18 : index
    %c0_98 = arith.constant 0 : index
    %286 = vector.load %arg4[%c18, %c0_98] : memref<24x128xf32, #tpu.memory_space<vmem>>, vector<1x32xf32>
    %287 = vector.broadcast %286 : vector<1x32xf32> to vector<16x32xf32>
    %288 = arith.addf %285, %287 : vector<16x32xf32>
    %289 = arith.addf %288, %193 : vector<16x32xf32>
    %c20 = arith.constant 20 : index
    %c0_99 = arith.constant 0 : index
    %290 = vector.load %arg4[%c20, %c0_99] : memref<24x128xf32, #tpu.memory_space<vmem>>, vector<1x32xf32>
    %c21 = arith.constant 21 : index
    %c0_100 = arith.constant 0 : index
    %291 = vector.load %arg4[%c21, %c0_100] : memref<24x128xf32, #tpu.memory_space<vmem>>, vector<1x32xf32>
    %cst_101 = arith.constant dense<0.000000e+00> : vector<16xf32>
    %292 = vector.multi_reduction <add>, %289, %cst_101 [1] : vector<16x32xf32> to vector<16xf32>
    %293 = vector.shape_cast %292 : vector<16xf32> to vector<16x1xf32>
    %cst_102 = arith.constant 3.200000e+01 : f32
    %294 = vector.broadcast %cst_102 : f32 to vector<16x1xf32>
    %295 = arith.divf %293, %294 : vector<16x1xf32>
    %296 = vector.broadcast %295 : vector<16x1xf32> to vector<16x32xf32>
    %297 = arith.subf %289, %296 : vector<16x32xf32>
    %298 = arith.mulf %297, %297 : vector<16x32xf32>
    %cst_103 = arith.constant dense<0.000000e+00> : vector<16xf32>
    %299 = vector.multi_reduction <add>, %298, %cst_103 [1] : vector<16x32xf32> to vector<16xf32>
    %300 = vector.shape_cast %299 : vector<16xf32> to vector<16x1xf32>
    %cst_104 = arith.constant 3.200000e+01 : f32
    %301 = vector.broadcast %cst_104 : f32 to vector<16x1xf32>
    %302 = arith.divf %300, %301 : vector<16x1xf32>
    %cst_105 = arith.constant 9.99999997E-7 : f32
    %303 = vector.broadcast %cst_105 : f32 to vector<16x1xf32>
    %304 = arith.addf %302, %303 : vector<16x1xf32>
    %305 = math.rsqrt %304 : vector<16x1xf32>
    %306 = vector.broadcast %305 : vector<16x1xf32> to vector<16x32xf32>
    %307 = arith.mulf %297, %306 : vector<16x32xf32>
    %308 = vector.broadcast %290 : vector<1x32xf32> to vector<16x32xf32>
    %309 = arith.mulf %307, %308 : vector<16x32xf32>
    %310 = vector.broadcast %291 : vector<1x32xf32> to vector<16x32xf32>
    %311 = arith.addf %309, %310 : vector<16x32xf32>
    %c352 = arith.constant 352 : index
    %c0_106 = arith.constant 0 : index
    %312 = vector.load %arg3[%c352, %c0_106] : memref<480x128xf32, #tpu.memory_space<vmem>>, vector<32x128xf32>
    %cst_107 = arith.constant dense<0.000000e+00> : vector<16x128xf32>
    %313 = tpu.matmul %311, %312, %cst_107 {dimension_numbers = #tpu.dot_dimension_numbers<[1], [0], [0], [1], [0, 0, 1, 1], [], []>} : vector<16x32xf32>, vector<32x128xf32>, vector<16x128xf32> -> vector<16x128xf32>
    %c17 = arith.constant 17 : index
    %c0_108 = arith.constant 0 : index
    %314 = vector.load %arg4[%c17, %c0_108] : memref<24x128xf32, #tpu.memory_space<vmem>>, vector<1x128xf32>
    %315 = vector.broadcast %314 : vector<1x128xf32> to vector<16x128xf32>
    %316 = arith.addf %313, %315 : vector<16x128xf32>
    %317 = vector.extract_strided_slice %316 {offsets = [0, 0], sizes = [16, 64], strides = [1, 1]} : vector<16x128xf32> to vector<16x64xf32>
    %318 = vector.extract_strided_slice %316 {offsets = [0, 64], sizes = [16, 64], strides = [1, 1]} : vector<16x128xf32> to vector<16x64xf32>
    %319 = arith.negf %317 : vector<16x64xf32>
    %320 = math.exp %319 : vector<16x64xf32>
    %cst_109 = arith.constant 1.000000e+00 : f32
    %321 = vector.broadcast %cst_109 : f32 to vector<16x64xf32>
    %322 = arith.addf %321, %320 : vector<16x64xf32>
    %323 = arith.divf %321, %322 : vector<16x64xf32>
    %324 = arith.mulf %317, %323 : vector<16x64xf32>
    %325 = arith.mulf %324, %318 : vector<16x64xf32>
    %c416 = arith.constant 416 : index
    %c0_110 = arith.constant 0 : index
    %326 = vector.load %arg3[%c416, %c0_110] : memref<480x128xf32, #tpu.memory_space<vmem>>, vector<64x32xf32>
    %cst_111 = arith.constant dense<0.000000e+00> : vector<16x32xf32>
    %327 = tpu.matmul %325, %326, %cst_111 {dimension_numbers = #tpu.dot_dimension_numbers<[1], [0], [0], [1], [0, 0, 1, 1], [], []>} : vector<16x64xf32>, vector<64x32xf32>, vector<16x32xf32> -> vector<16x32xf32>
    %c19 = arith.constant 19 : index
    %c0_112 = arith.constant 0 : index
    %328 = vector.load %arg4[%c19, %c0_112] : memref<24x128xf32, #tpu.memory_space<vmem>>, vector<1x32xf32>
    %329 = vector.broadcast %328 : vector<1x32xf32> to vector<16x32xf32>
    %330 = arith.addf %327, %329 : vector<16x32xf32>
    %331 = arith.addf %330, %311 : vector<16x32xf32>
    %c22 = arith.constant 22 : index
    %c0_113 = arith.constant 0 : index
    %332 = vector.load %arg4[%c22, %c0_113] : memref<24x128xf32, #tpu.memory_space<vmem>>, vector<1x32xf32>
    %c23 = arith.constant 23 : index
    %c0_114 = arith.constant 0 : index
    %333 = vector.load %arg4[%c23, %c0_114] : memref<24x128xf32, #tpu.memory_space<vmem>>, vector<1x32xf32>
    %cst_115 = arith.constant dense<0.000000e+00> : vector<16xf32>
    %334 = vector.multi_reduction <add>, %331, %cst_115 [1] : vector<16x32xf32> to vector<16xf32>
    %335 = vector.shape_cast %334 : vector<16xf32> to vector<16x1xf32>
    %cst_116 = arith.constant 3.200000e+01 : f32
    %336 = vector.broadcast %cst_116 : f32 to vector<16x1xf32>
    %337 = arith.divf %335, %336 : vector<16x1xf32>
    %338 = vector.broadcast %337 : vector<16x1xf32> to vector<16x32xf32>
    %339 = arith.subf %331, %338 : vector<16x32xf32>
    %340 = arith.mulf %339, %339 : vector<16x32xf32>
    %cst_117 = arith.constant dense<0.000000e+00> : vector<16xf32>
    %341 = vector.multi_reduction <add>, %340, %cst_117 [1] : vector<16x32xf32> to vector<16xf32>
    %342 = vector.shape_cast %341 : vector<16xf32> to vector<16x1xf32>
    %cst_118 = arith.constant 3.200000e+01 : f32
    %343 = vector.broadcast %cst_118 : f32 to vector<16x1xf32>
    %344 = arith.divf %342, %343 : vector<16x1xf32>
    %cst_119 = arith.constant 9.99999997E-7 : f32
    %345 = vector.broadcast %cst_119 : f32 to vector<16x1xf32>
    %346 = arith.addf %344, %345 : vector<16x1xf32>
    %347 = math.rsqrt %346 : vector<16x1xf32>
    %348 = vector.broadcast %347 : vector<16x1xf32> to vector<16x32xf32>
    %349 = arith.mulf %339, %348 : vector<16x32xf32>
    %350 = vector.broadcast %332 : vector<1x32xf32> to vector<16x32xf32>
    %351 = arith.mulf %349, %350 : vector<16x32xf32>
    %352 = vector.broadcast %333 : vector<1x32xf32> to vector<16x32xf32>
    %353 = arith.addf %351, %352 : vector<16x32xf32>
    %c0_120 = arith.constant 0 : index
    %c0_121 = arith.constant 0 : index
    %354 = vector.load %arg6[%c0_120, %c0_121] : memref<16x32xf32, #tpu.memory_space<vmem>>, vector<16x32xf32>
    tpu.vector_store %arg6[%c0_120, %c0_121], %353 {strides = array<i32>} : memref<16x32xf32, #tpu.memory_space<vmem>>, vector<16x32xf32>,
    %c128 = arith.constant 128 : index
    %c0_122 = arith.constant 0 : index
    %355 = vector.load %arg3[%c128, %c0_122] : memref<480x128xf32, #tpu.memory_space<vmem>>, vector<32x128xf32>
    %cst_123 = arith.constant dense<0.000000e+00> : vector<16x128xf32>
    %356 = tpu.matmul %353, %355, %cst_123 {dimension_numbers = #tpu.dot_dimension_numbers<[1], [0], [0], [1], [0, 0, 1, 1], [], []>} : vector<16x32xf32>, vector<32x128xf32>, vector<16x128xf32> -> vector<16x128xf32>
    %c2 = arith.constant 2 : index
    %c0_124 = arith.constant 0 : index
    %357 = vector.load %arg4[%c2, %c0_124] : memref<24x128xf32, #tpu.memory_space<vmem>>, vector<1x128xf32>
    %358 = vector.broadcast %357 : vector<1x128xf32> to vector<16x128xf32>
    %359 = arith.addf %356, %358 : vector<16x128xf32>
    %c0_125 = arith.constant 0 : index
    %c0_126 = arith.constant 0 : index
    %360 = vector.load %arg5[%c0_125, %c0_126] : memref<16x128xf32, #tpu.memory_space<vmem>>, vector<16x128xf32>
    tpu.vector_store %arg5[%c0_125, %c0_126], %359 {strides = array<i32>} : memref<16x128xf32, #tpu.memory_space<vmem>>, vector<16x128xf32>,
    return
  }
}

</mosaic_0001>

<bundles_post_ra>
// kernel: _pldr_forward_jit.1
= control target key start
LH: loop header
LB: loop body
LE: loop exit
PB: predicated region body
PF: predicated region fallthrough
CT: control target
= control target key end

     0   :  { %13 = vsyncpa [#allocation3], 0  ;;  %s4740_s0 = inlined_call_operand.vmem [shape: s32[16,1], index: 0, kind: input, shape index: {}]   ;;  %s4741_s1 = inlined_call_operand.hbm [shape: f32[16,16], index: 1, kind: input, shape index: {}]   ;;  %s4742_s2 = inlined_call_operand.hbm [shape: f32[48,128], index: 2, kind: input, shape index: {}]   ;;  %s4743_s3 = inlined_call_operand.hbm [shape: f32[480,128], index: 3, kind: input, shape index: {}]   ;;  %s4744_s4 = inlined_call_operand.vmem [shape: f32[24,128], index: 4, kind: input, shape index: {}]   ;;  %s4745_s5 = inlined_call_operand.hbm [shape: f32[16,128], index: 5, kind: output, shape index: {0}]   ;;  %s4746_s6 = inlined_call_operand.hbm [shape: f32[16,32], index: 6, kind: output, shape index: {1}]   ;;  %s4747_s7 = inlined_call_operand.vmem [shape: f32[16,128], index: 7, kind: output, shape index: {2}]  }
   0x1   :  { %14 = vsyncpa [#allocation6], 0 }
   0x2   :  { %15 = vsyncpa [#allocation4], 0 }
   0x3   :  { %16 = vsyncpa [#allocation10], 0  ;;  %s4134_s24 = smov [#allocation5]   ;;  %s4135_s26 = smov [#allocation2]  }
   0x4   :  { %s36_s25 = sshll.u32 %s4134_s24, 4  ;;  %s24_s27 = sshll.u32 %s4135_s26, 4  ;;  %s37_s25 = int_to_ptr.vmem [resolvable:$true] %s36_s25  ;;  %s4199_s27 = int_to_ptr.vmem [resolvable:$true] %s24_s27 }
   0x5   :  { %s4016_s30 = scalar_lea.hbm %s4742_s2, 768 }
   0x6   :  { %p4017_p0 = scmp.ne.s32.totalorder %s4742_s2, %s4016_s30  ;;  %p4020_p1 = scmp.lt.u32.totalorder %s4016_s30, %s4742_s2 }
   0x8   :  { %p4022_p2 = pnand %p4020_p1, %p4017_p0 }
   0xa   :  { %4025 = shalt.err (!%p4022_p2)
}
   0xb   :  { %s4026_s12 = scalar_lea.vmem %s37_s25, 768  ;;  %p4031_p4 = scmp.lt.s32.totalorder %s37_s25, %s37_s25 }
   0xc   :  { %p4027_p3 = scmp.ne.s32.totalorder %s37_s25, %s4026_s12  ;;  %p4032_p5 = scmp.lt.s32.totalorder %s4026_s12, %s4026_s12 }
   0xe   :  { %p4033_p6 = por %p4032_p5, %p4031_p4 }
  0x10   :  { %p4034_p7 = pnand %p4033_p6, %p4027_p3 }
  0x12   :  { %4037 = shalt.err (!%p4034_p7)
}
  0x13   :  { %s4136_s13 = smov 128   ;;  %s4137_s14 = smov 8  }
  0x14   :  { %42 = dma.hbm_to_vmem [thread:$0]  %s4742_s2, 768, %s37_s25, [#allocation6], %s4136_s13, %s4136_s13, %s4137_s14  }
  0x15   :  { %s4038_s19 = scalar_lea.hbm %s4741_s1, 256 }
  0x16   :  { %p4039_p8 = scmp.ne.s32.totalorder %s4741_s1, %s4038_s19  ;;  %p4042_p9 = scmp.lt.u32.totalorder %s4038_s19, %s4741_s1 }
  0x18   :  { %p4044_p10 = pnand %p4042_p9, %p4039_p8 }
  0x1a   :  { %4047 = shalt.err (!%p4044_p10)
}
  0x1b   :  { %s4048_s24 = scalar_lea.vmem %s4199_s27, 256  ;;  %p4053_p12 = scmp.lt.s32.totalorder %s4199_s27, %s4199_s27 }
  0x1c   :  { %p4049_p11 = scmp.ne.s32.totalorder %s4199_s27, %s4048_s24  ;;  %p4054_p13 = scmp.lt.s32.totalorder %s4048_s24, %s4048_s24 }
  0x1e   :  { %p4055_p0 = por %p4054_p13, %p4053_p12 }
  0x20   :  { %p4056_p1 = pnand %p4055_p0, %p4049_p11 }
  0x22   :  { %4059 = shalt.err (!%p4056_p1)
}
  0x23   :  { %30 = dma.hbm_to_vmem [thread:$0]  %s4741_s1, 256, %s4199_s27, [#allocation3], %s4136_s13, %s4136_s13, %s4137_s14  }
  0x24   :  { %s4138_s26 = smov [#allocation7]   ;;  %s4060_s8 = scalar_lea.hbm %s4743_s3, 7680 }
  0x25   :  { %s48_s28 = sshll.u32 %s4138_s26, 4  ;;  %p4061_p2 = scmp.ne.s32.totalorder %s4743_s3, %s4060_s8  ;;  %s49_s28 = int_to_ptr.vmem [resolvable:$true] %s48_s28 }
  0x26   :  { %p4064_p3 = scmp.lt.u32.totalorder %s4060_s8, %s4743_s3 }
  0x28   :  { %p4066_p4 = pnand %p4064_p3, %p4061_p2 }
  0x2a   :  { %4069 = shalt.err (!%p4066_p4)
}
  0x2b   :  { %s4070_s15 = scalar_lea.vmem %s49_s28, 7680  ;;  %p4075_p6 = scmp.lt.s32.totalorder %s49_s28, %s49_s28 }
  0x2c   :  { %p4071_p5 = scmp.ne.s32.totalorder %s49_s28, %s4070_s15  ;;  %p4076_p7 = scmp.lt.s32.totalorder %s4070_s15, %s4070_s15 }
  0x2e   :  { %p4077_p8 = por %p4076_p7, %p4075_p6 }
  0x30   :  { %p4078_p9 = pnand %p4077_p8, %p4071_p5 }
  0x32   :  { %4081 = shalt.err (!%p4078_p9)
}
  0x33   :  { %54 = dma.hbm_to_vmem [thread:$0]  %s4743_s3, 7680, %s49_s28, [#allocation6], %s4136_s13, %s4136_s13, %s4137_s14  }
  0x34   :  { %4126 = dma.done.wait [#allocation3], 256  }
  0x35   :  { %4127 = vsyncadd [#allocation3], 4294967040 }
  0x36   :  { %4128 = dma.done.wait [#allocation6], 8448  }
  0x37   :  { %4129 = vsyncadd [#allocation6], 4294958848  ;;  %v4139_v0 = vmov 0   ;;  %v66_v1 = vld [vmem:[%s4740_s0] sm:$0xff]  ;;  %v83_v3 = vld [vmem:[#allocation7 + $0x8] sm:$0xff]  ;;  %v68_v27 = vlaneseq  ;;  %v4140_v30 = vmov 1.0  }
  0x38   :  { %3818 = vset.pattern.permute.xlu0 %v4139_v0  ;;  %v82_v2 = vld [vmem:[#allocation7] sm:$0xff]  ;;  %v84_v4 = vld [vmem:[#allocation7 + $0x10] sm:$0xff]  ;;  %v85_v5 = vld [vmem:[#allocation7 + $0x18] sm:$0xff]  ;;  %vm175_vm2 = vcmask 261120   ;;  %s4141_s24 = smov 127   ;;  %s4142_s2 = smov 1  }
  0x39   :  { %71 = vperm.xlu0 %3818, %v66_v1   ;;  %v67_v6 = vld [vmem:[%s4740_s0 + $0x8] sm:$0xff]  ;;  %v3593_v7 = vpack.c.bf16 %v83_v3, %v82_v2  ;;  %v3597_v8 = vpack.c.bf16 %v85_v5, %v84_v4  ;;  %v86_v9 = vld [vmem:[#allocation7 + $0x20] sm:$0xff]  ;;  %v88_v12 = vld [vmem:[#allocation7 + $0x30] sm:$0xff]  ;;  %v69_v28 = vand.u32 127, %v68_v27  ;;  %vm352_vm3 = vcmask 64512   ;;  %s4143_s25 = smov 96  }
  0x3a   :  { %v87_v10 = vld [vmem:[#allocation7 + $0x28] sm:$0xff]  ;;  %v89_v13 = vld [vmem:[#allocation7 + $0x38] sm:$0xff]  ;;  %v90_v15 = vld [vmem:[#allocation7 + $0x40] sm:$0xff]  ;;  %vm440_vm5 = vcmask 130048   ;;  %s4144_s8 = smov 64   ;;  %s4145_s9 = smov 88  }
  0x3b   :  { %3594 = vmatprep.subr.bf16.mxu0 %v3593_v7  ;;  %v3601_v11 = vpack.c.bf16 %v87_v10, %v86_v9  ;;  %v3605_v14 = vpack.c.bf16 %v89_v13, %v88_v12  ;;  %v91_v16 = vld [vmem:[#allocation7 + $0x48] sm:$0xff]  ;;  %v92_v18 = vld [vmem:[#allocation7 + $0x50] sm:$0xff]  ;;  %v93_v19 = vld [vmem:[#allocation7 + $0x58] sm:$0xff]  ;;  %s4146_s10 = smov 120   ;;  %s4147_s11 = smov 112   ;;  %vm1190_vm6 = vcmask 195584  }
  0x3c   :  { %3596 = vmatpush3.bf16.msra.mxu0 %v3593_v7  ;;  %v3609_v17 = vpack.c.bf16 %v91_v16, %v90_v15  ;;  %v3613_v20 = vpack.c.bf16 %v93_v19, %v92_v18  ;;  %v94_v21 = vld [vmem:[#allocation7 + $0x60] sm:$0xff]  ;;  %v95_v22 = vld [vmem:[#allocation7 + $0x68] sm:$0xff]  ;;  %v96_v24 = vld [vmem:[#allocation7 + $0x70] sm:$0xff]  ;;  %s4148_s12 = smov 80   ;;  %s4149_s15 = smov 48   ;;  %vm1468_vm7 = vcmask 523264  }
  0x3d   :  { %74 = vperm.xlu0 %3818, %v67_v6   ;;  %3598 = vmatprep.subr.bf16.mxu0 %v3597_v8  ;;  %v3617_v23 = vpack.c.bf16 %v95_v22, %v94_v21  ;;  %v97_v25 = vld [vmem:[#allocation7 + $0x78] sm:$0xff]  ;;  %v223_v46 = vld [vmem:[#allocation7 + $0xa0] sm:$0xff]  ;;  %v224_v47 = vld [vmem:[#allocation7 + $0xa8] sm:$0xff]  ;;  %s4150_s1 = smov 56   ;;  %s4151_s27 = smov 72   ;;  %vm349_vm8 = vcmask 523520  }
  0x3e   :  { %v3621_v26 = vpack.c.bf16 %v97_v25, %v96_v24  ;;  %v225_v48 = vld [vmem:[#allocation7 + $0xb0] sm:$0xff]  ;;  %v3625_v49 = vpack.c.bf16 %v224_v47, %v223_v46  ;;  %v226_v50 = vld [vmem:[#allocation7 + $0xb8] sm:$0xff]  ;;  %v3098_v59 = vld [vmem:[%s4744_s4] ss:$0 sm:$0xff]  ;;  %s4152_s16 = smov 104   ;;  %s4153_s17 = smov 40  }
  0x3f   :  { %v3629_v51 = vpack.c.bf16 %v226_v50, %v225_v48  ;;  %v3099_v61 = vld [vmem:[%s4744_s4 + $0x1] ss:$0 sm:$0xff]  ;;  %v3100_v4 = vld [vmem:[%s4744_s4 + $0x8] ss:$0 sm:$0xff]  ;;  %v4297_v15 = vld [vmem:[#allocation5 + $0x20] sm:$0xff]  ;;  %s4154_s18 = smov 16  }
  0x40   :  { %3600 = vmatpush3.bf16.msra.mxu0 %v3597_v8  ;;  %3626 = vmatprep.subr.bf16.mxu1 %v3625_v49  ;;  %v4290_v10 = vld [vmem:[#allocation5 + $0x10] sm:$0xff]  ;;  %v4305_v22 = vld [vmem:[#allocation5 + $0x28] sm:$0xff]  ;;  %vm4326_vm4 = vmpackc.low %vm352_vm3, %vm352_vm3  ;;  %s4155_s19 = smov 24   ;;  %vm1708_vm9 = vcmask 785920   ;;  %vm1719_vm10 = vcmask 1048320  }
  0x41   :  { %3602 = vmatprep.subr.bf16.mxu0 %v3601_v11  ;;  %3628 = vmatpush3.bf16.msra.mxu1 %v3625_v49 }
  0x42   :  { %3630 = vmatprep.subr.bf16.mxu1 %v3629_v51 }
  0x44   :  { %3604 = vmatpush3.bf16.msra.mxu0 %v3601_v11  ;;  %v4292_v11 = vld [vmem:[#allocation5] sm:$0xff] }
  0x45   :  { %3606 = vmatprep.subr.bf16.mxu0 %v3605_v14  ;;  %3632 = vmatpush3.bf16.msra.mxu1 %v3629_v51 }
  0x48   :  { %3608 = vmatpush3.bf16.msra.mxu0 %v3605_v14  ;;  %v4295_v14 = vld [vmem:[#allocation5 + $0x18] sm:$0xff] }
  0x49   :  { %3610 = vmatprep.subr.bf16.mxu0 %v3609_v17 }
  0x4c   :  { %3612 = vmatpush3.bf16.msra.mxu0 %v3609_v17  ;;  %v4301_v17 = vld [vmem:[#allocation5 + $0x8] sm:$0xff] }
  0x4d   :  { %3614 = vmatprep.subr.bf16.mxu0 %v3613_v20 }
  0x50   :  { %3616 = vmatpush3.bf16.msra.mxu0 %v3613_v20 }
  0x51   :  { %3618 = vmatprep.subr.bf16.mxu0 %v3617_v23 }
  0x54   :  { %3620 = vmatpush3.bf16.msra.mxu0 %v3617_v23 }
  0x55   :  { %3622 = vmatprep.subr.bf16.mxu0 %v3621_v26 }
  0x58   :  { %3624 = vmatpush3.bf16.msra.mxu0 %v3621_v26 }
  0xb8   :  { %v72_v29 = vpop.permute.xlu0 %71 }
  0xb9   :  { %vm76_vm0 = vcmp.eq.s32.totalorder %v69_v28, %v72_v29 }
  0xba   :  { %3363 = vmatprep.mubr.msk.f32.mxu0 %vm76_vm0, %v4140_v30 }
  0xbc   :  { %v75_v31 = vpop.permute.xlu0 %74 }
  0xbd   :  { %vm77_vm1 = vcmp.eq.s32.totalorder %v69_v28, %v75_v31  ;;  %v2566_v31 = vld [vmem:[#allocation7 + $0x190] sm:$0xff] }
  0xbe   :  { %3364 = vmatmul.mubr.msk.f32.vlgmr.msra.gmra.mrb[0].mxu0 %vm77_vm1, %v4140_v30 }
 0x191   :  { %v3365_v32 = vpop.f32.mrb[0].mxu0 }
 0x192   :  { %v164_v33 = vpop.f32.mrb[1].mxu0  ;;  %v179_v35 = vsel %vm175_vm2, %v3365_v32, 0.0 }
 0x193   :  { %v176_v34 = vsel %vm175_vm2, %v164_v33, 0.0 }
 0x194   :  { %177 = vadd.xlane.f32.xlu1 %v176_v34  ;;  %v4340_v34 = vld [vmem:[#allocation2 + $0x8] sm:$0xff] }
 0x198   :  { %180 = vadd.xlane.f32.xlu1 %v179_v35 }
 0x221   :  { %v178_v36 = vpop.xlane.xlu1 %177 }
 0x222   :  { %v183_v37 = vmul.f32 0.03125, %v178_v36 }
 0x224   :  { %v185_v38 = vsub.f32 %v164_v33, %v183_v37  ;;  %v4342_v37 = vld [vmem:[#allocation2] sm:$0xff] }
 0x225   :  { %v181_v39 = vpop.xlane.xlu1 %180 }
 0x226   :  { %v184_v40 = vmul.f32 0.03125, %v181_v39  ;;  %v187_v41 = vmul.f32 %v185_v38, %v185_v38 }
 0x228   :  { %v186_v42 = vsub.f32 %v3365_v32, %v184_v40  ;;  %v189_v43 = vsel %vm175_vm2, %v187_v41, 0.0 }
 0x229   :  { %190 = vadd.xlane.f32.xlu0 %v189_v43 }
 0x22a   :  { %v188_v44 = vmul.f32 %v186_v42, %v186_v42 }
 0x22c   :  { %v192_v45 = vsel %vm175_vm2, %v188_v44, 0.0 }
 0x22d   :  { %193 = vadd.xlane.f32.xlu1 %v192_v45 }
 0x2b6   :  { %v191_v52 = vpop.xlane.xlu0 %190 }
 0x2b7   :  { %v195_v53 = vmul.f32 0.03125, %v191_v52 }
 0x2b9   :  { %v197_v54 = vadd.f32 1e-06, %v195_v53 }
 0x2ba   :  { %v194_v55 = vpop.xlane.xlu1 %193 }
 0x2bb   :  { %3914 = vrsqrt.f32 %v197_v54  ;;  %v196_v56 = vmul.f32 0.03125, %v194_v55 }
 0x2bd   :  { %v198_v57 = vadd.f32 1e-06, %v196_v56 }
 0x2bf   :  { %3916 = vrsqrt.f32 %v198_v57 }
 0x2c5   :  { %v3915_v58 = vpop.eup %3914 }
 0x2c6   :  { %v201_v60 = vmul.f32 %v3915_v58, %v185_v38 }
 0x2c8   :  { %v207_v62 = vmul.f32 %v3098_v59, %v201_v60 }
 0x2c9   :  { %v3917_v63 = vpop.eup %3916 }
 0x2ca   :  { %v202_v0 = vmul.f32 %v3917_v63, %v186_v42  ;;  %v4267_v1 = vadd.f32 %v3099_v61, %v207_v62 }
 0x2cc   :  { %v208_v2 = vmul.f32 %v3098_v59, %v202_v0  ;;  %3374 = vmatprep.mubr.msk.f32.mxu1 %vm175_vm2, %v4267_v1 }
 0x2ce   :  { %v4271_v3 = vadd.f32 %v3099_v61, %v208_v2 }
 0x2d0   :  { %3375 = vmatmul.mubr.msk.f32.vlgmr.msra.gmra.mrb[0].mxu1 %vm175_vm2, %v4271_v3 }
 0x3a3   :  { %v3376_v5 = vpop.f32.mrb[0].mxu1 }
 0x3a4   :  { %v4278_v6 = vadd.f32 %v3376_v5, %v3100_v4  ;;  %v304_v7 = vpop.f32.mrb[1].mxu1 }
 0x3a5   :  { %v4282_v8 = vadd.f32 %v3100_v4, %v304_v7 }
 0x3a6   :  { %315 = vrot.lane.b32.xlu1 %v4278_v6, %s4141_s24  ;;  %v322_v23 = vmul.f32 %v4278_v6, %v4301_v17 }
 0x3a7   :  { %v321_v16 = vmul.f32 %v4282_v8, %v4292_v11  ;;  %v4350_v43 = vpack.i.bf16 %v4278_v6, %v4282_v8 }
 0x3aa   :  { %313 = vrot.lane.b32.xlu1 %v4282_v8, %s4141_s24 }
 0x3ae   :  { %317 = vrot.lane.b32.xlu1 %v4282_v8, %s4142_s2 }
 0x3b2   :  { %319 = vrot.lane.b32.xlu1 %v4278_v6, %s4142_s2 }
 0x418   :  { %v316_v9 = vpop.permute.xlu1 %315 }
 0x419   :  { %v324_v19 = vmul.f32 %v316_v9, %v4295_v14 }
 0x41b   :  { %v326_v26 = vadd.f32 %v324_v19, %v322_v23 }
 0x41c   :  { %v314_v12 = vpop.permute.xlu1 %313 }
 0x41d   :  { %v323_v13 = vmul.f32 %v314_v12, %v4290_v10 }
 0x41f   :  { %v325_v20 = vadd.f32 %v323_v13, %v321_v16 }
 0x420   :  { %v318_v18 = vpop.permute.xlu1 %317 }
 0x421   :  { %v327_v21 = vmul.f32 %v318_v18, %v4297_v15 }
 0x423   :  { %v4309_v24 = vadd.f32 %v327_v21, %v325_v20 }
 0x424   :  { %v320_v25 = vpop.permute.xlu1 %319 }
 0x425   :  { %v328_v27 = vmul.f32 %v320_v25, %v4305_v22  ;;  %333 = vrot.lane.b32.xlu0 %v4309_v24, %s4143_s25  ;;  %3381 = vmatprep.mubr.msk.f32.mxu1 %vm352_vm3, %v4309_v24 }
 0x427   :  { %v4316_v28 = vadd.f32 %v328_v27, %v326_v26 }
 0x429   :  { %335 = vrot.lane.b32.xlu1 %v4316_v28, %s4143_s25  ;;  %v4356_v44 = vpack.i.bf16 %v4316_v28, %v4309_v24 }
 0x497   :  { %v334_v29 = vpop.permute.xlu0 %333 }
 0x498   :  { %339 = vst.msk [vmem:[%s4747_s7] sm:$0xff] %vm175_vm2, %v334_v29 }
 0x49b   :  { %v336_v30 = vpop.permute.xlu1 %335 }
 0x49c   :  { %340 = vst.msk [vmem:[%s4747_s7 + $0x8] sm:$0xff] %vm175_vm2, %v336_v30  ;;  %v3633_v32 = vpack.c.bf16 %v336_v30, %v334_v29 }
 0x49e   :  { %3635 = vmatprep.subr.msk.bf16.mxu1 %vm4326_vm4, %v3633_v32 }
 0x49f   :  { %3638 = vmatpush3.bf16.xpose.msk.msra.mxu1 %vm4326_vm4, %v3633_v32 }
 0x4a6   :  { %3382 = vmatmul.mubr.msk.f32.vlgmr.msra.gmra.mrb[2].mxu1 %vm352_vm3, %v4316_v28 }
 0x579   :  { %v3383_v33 = vpop.f32.mrb[2].mxu1 }
 0x57a   :  { %v437_v35 = vmul.f32 0.35355338, %v3383_v33  ;;  %v427_v36 = vpop.f32.mrb[3].mxu1 }
 0x57b   :  { %v436_v38 = vmul.f32 0.35355338, %v427_v36 }
 0x57c   :  { %v439_v39 = vadd.f32 %v437_v35, %v4340_v34 }
 0x57d   :  { %v438_v40 = vadd.f32 %v436_v38, %v4342_v37 }
 0x57e   :  { %v444_v41 = vsel %vm440_vm5, %v439_v39, -inf }
 0x57f   :  { %445 = vmax.xlane.f32.xlu0 %v444_v41  ;;  %v441_v42 = vsel %vm440_vm5, %v438_v40, -inf }
 0x580   :  { %442 = vmax.xlane.f32.xlu1 %v441_v42 }
 0x591   :  { %3820 = vrot.lane.b32.xlu1 %v4350_v43, %s4144_s8 }
 0x595   :  { %3825 = vrot.lane.b32.xlu0 %v4356_v44, %s4145_s9  ;;  %550 = vrot.lane.b32.xlu1 %v4309_v24, %s4146_s10 }
 0x599   :  { %552 = vrot.lane.b32.xlu0 %v4316_v28, %s4146_s10 }
 0x59d   :  { %756 = vrot.lane.b32.xlu0 %v4316_v28, %s4147_s11 }
 0x60c   :  { %v446_v45 = vpop.xlane.xlu0 %445 }
 0x60d   :  { %v448_v46 = vsub.f32 %v439_v39, %v446_v45  ;;  %v443_v47 = vpop.xlane.xlu1 %442 }
 0x60e   :  { %v447_v48 = vsub.f32 %v438_v40, %v443_v47 }
 0x60f   :  { %v451_v49 = vmul.f32 1.442695, %v448_v46 }
 0x610   :  { %v449_v50 = vmul.f32 1.442695, %v447_v48  ;;  %v3826_v51 = vpop.permute.xlu0 %3825 }
 0x611   :  { %3918 = vpow2.f32 %v451_v49  ;;  %v3821_v52 = vpop.permute.xlu1 %3820  ;;  %v3828_v53 = vunpack.i.h.bf16 %v3826_v51  ;;  %v3827_v54 = vunpack.i.l.bf16 %v3826_v51 }
 0x612   :  { %v3823_v55 = vunpack.i.h.bf16 %v3821_v52  ;;  %v3822_v56 = vunpack.i.l.bf16 %v3821_v52  ;;  %3920 = vpow2.f32 %v449_v50 }
 0x613   :  { %v3643_v58 = vpack.c.bf16 %v3828_v53, %v3827_v54 }
 0x614   :  { %v3639_v57 = vpack.c.bf16 %v3823_v55, %v3822_v56  ;;  %v553_v16 = vpop.permute.xlu0 %552 }
 0x615   :  { %v551_v63 = vpop.permute.xlu1 %550 }
 0x616   :  { %3640 = vmatprep.subr.bf16.mxu1 %v3639_v57 }
 0x617   :  { %3642 = vmatpush3.bf16.msra.mxu1 %v3639_v57 }
 0x618   :  { %3645 = vmatprep.subr.msk.bf16.mxu1 %vm4326_vm4, %v3643_v58  ;;  %v757_v21 = vpop.permute.xlu0 %756 }
 0x61b   :  { %v3919_v59 = vpop.eup %3918 }
 0x61c   :  { %v456_v60 = vsel %vm440_vm5, %v3919_v59, 0.0  ;;  %v3921_v61 = vpop.eup %3920 }
 0x61d   :  { %457 = vadd.xlane.f32.xlu1 %v456_v60  ;;  %v453_v62 = vsel %vm440_vm5, %v3921_v61, 0.0 }
 0x621   :  { %454 = vadd.xlane.f32.xlu1 %v453_v62 }
 0x632   :  { %3830 = vrot.lane.b32.xlu1 %v4356_v44, %s4148_s12 }
 0x636   :  { %754 = vrot.lane.b32.xlu1 %v4309_v24, %s4147_s11 }
 0x6aa   :  { %v458_v0 = vpop.xlane.xlu1 %457 }
 0x6ab   :  { %3922 = vrcp.f32 %v458_v0 }
 0x6ae   :  { %v455_v2 = vpop.xlane.xlu1 %454 }
 0x6af   :  { %3924 = vrcp.f32 %v455_v2 }
 0x6b2   :  { %v3831_v4 = vpop.permute.xlu1 %3830 }
 0x6b3   :  { %v3833_v5 = vunpack.i.h.bf16 %v3831_v4  ;;  %v3832_v7 = vunpack.i.l.bf16 %v3831_v4 }
 0x6b5   :  { %v3653_v9 = vpack.c.bf16 %v3833_v5, %v3832_v7  ;;  %v3923_v13 = vpop.eup %3922 }
 0x6b6   :  { %v755_v12 = vpop.permute.xlu1 %754  ;;  %v462_v20 = vmul.f32 %v3923_v13, %v3919_v59 }
 0x6b7   :  { %3655 = vmatprep.subr.msk.bf16.mxu0 %vm4326_vm4, %v3653_v9  ;;  %3409 = vmatprep.mubr.msk.f32.mxu0 %vm352_vm3, %v755_v12 }
 0x6b8   :  { %3658 = vmatpush3.bf16.xpose.msk.msra.mxu0 %vm4326_vm4, %v3653_v9 }
 0x6b9   :  { %v3925_v18 = vpop.eup %3924 }
 0x6ba   :  { %v461_v19 = vmul.f32 %v3925_v18, %v3921_v61 }
 0x6bc   :  { %3388 = vmatprep.mubr.msk.f32.mxu1 %vm440_vm5, %v461_v19 }
 0x6bd   :  { %3389 = vmatmul.mubr.msk.f32.vlgmr.msra.gmra.mrb[4].mxu1 %vm440_vm5, %v462_v20 }
 0x6be   :  { %3648 = vmatpush3.bf16.xpose.msk.msra.mxu1 %vm4326_vm4, %v3643_v58  ;;  %3395 = vmatprep.mubr.msk.f32.mxu1 %vm352_vm3, %v551_v63 }
 0x6bf   :  { %3410 = vmatmul.mubr.msk.f32.vlgmr.msra.gmra.mrb[2].mxu0 %vm352_vm3, %v757_v21 }
 0x6c5   :  { %3396 = vmatmul.mubr.msk.f32.vlgmr.msra.gmra.mrb[6].mxu1 %vm352_vm3, %v553_v16 }
 0x790   :  { %v4386_v23 = vpop.f32.mrb[4].mxu1 }
 0x791   :  { %v4388_v25 = vpop.f32.mrb[5].mxu1 }
 0x792   :  { %v3411_v26 = vpop.f32.mrb[2].mxu0 }
 0x793   :  { %v836_v27 = vpop.f32.mrb[3].mxu0  ;;  %v846_v35 = vmul.f32 0.35355338, %v3411_v26 }
 0x794   :  { %v845_v30 = vmul.f32 0.35355338, %v836_v27 }
 0x795   :  { %v848_v45 = vadd.f32 %v846_v35, %v4340_v34 }
 0x796   :  { %v847_v41 = vadd.f32 %v845_v30, %v4342_v37 }
 0x797   :  { %v852_v47 = vsel %vm440_vm5, %v848_v45, -inf }
 0x798   :  { %v3397_v29 = vpop.f32.mrb[6].mxu1  ;;  %v849_v46 = vsel %vm440_vm5, %v847_v41, -inf }
 0x799   :  { %v642_v32 = vmul.f32 0.35355338, %v3397_v29  ;;  %v632_v33 = vpop.f32.mrb[7].mxu1 }
 0x79a   :  { %v641_v36 = vmul.f32 0.35355338, %v632_v33 }
 0x79b   :  { %v644_v38 = vadd.f32 %v642_v32, %v4340_v34 }
 0x79c   :  { %v643_v39 = vadd.f32 %v641_v36, %v4342_v37 }
 0x79d   :  { %v648_v40 = vsel %vm440_vm5, %v644_v38, -inf }
 0x79e   :  { %649 = vmax.xlane.f32.xlu0 %v648_v40  ;;  %v645_v42 = vsel %vm440_vm5, %v643_v39, -inf }
 0x79f   :  { %646 = vmax.xlane.f32.xlu1 %v645_v42 }
 0x7a2   :  { %850 = vmax.xlane.f32.xlu0 %v849_v46 }
 0x7a3   :  { %853 = vmax.xlane.f32.xlu1 %v852_v47 }
 0x82b   :  { %v650_v48 = vpop.xlane.xlu0 %649 }
 0x82c   :  { %v647_v49 = vpop.xlane.xlu1 %646  ;;  %v652_v51 = vsub.f32 %v644_v38, %v650_v48 }
 0x82d   :  { %v651_v50 = vsub.f32 %v643_v39, %v647_v49 }
 0x82e   :  { %v655_v58 = vmul.f32 1.442695, %v652_v51 }
 0x82f   :  { %v851_v52 = vpop.xlane.xlu0 %850  ;;  %v653_v56 = vmul.f32 1.442695, %v651_v50 }
 0x830   :  { %v855_v53 = vsub.f32 %v847_v41, %v851_v52  ;;  %v854_v54 = vpop.xlane.xlu1 %853 }
 0x831   :  { %v856_v55 = vsub.f32 %v848_v45, %v854_v54 }
 0x832   :  { %v857_v57 = vmul.f32 1.442695, %v855_v53 }
 0x833   :  { %v859_v59 = vmul.f32 1.442695, %v856_v55 }
 0x834   :  { %3926 = vpow2.f32 %v857_v57 }
 0x835   :  { %3928 = vpow2.f32 %v859_v59  ;;  %v1196_v59 = vld [vmem:[#allocation7 + $0xf8] sm:$0xff] }
 0x836   :  { %3930 = vpow2.f32 %v653_v56 }
 0x837   :  { %3932 = vpow2.f32 %v655_v58  ;;  %v1195_v58 = vld [vmem:[#allocation7 + $0xf0] sm:$0xff] }
 0x83e   :  { %v3927_v60 = vpop.eup %3926 }
 0x83f   :  { %v3929_v61 = vpop.eup %3928  ;;  %v861_v62 = vsel %vm440_vm5, %v3927_v60, 0.0 }
 0x840   :  { %v3931_v63 = vpop.eup %3930  ;;  %862 = vadd.xlane.f32.xlu0 %v861_v62  ;;  %v864_v0 = vsel %vm440_vm5, %v3929_v61, 0.0 }
 0x841   :  { %v3933_v2 = vpop.eup %3932  ;;  %865 = vadd.xlane.f32.xlu1 %v864_v0  ;;  %v657_v4 = vsel %vm440_vm5, %v3931_v63, 0.0 }
 0x842   :  { %v660_v5 = vsel %vm440_vm5, %v3933_v2, 0.0 }
 0x844   :  { %658 = vadd.xlane.f32.xlu0 %v657_v4 }
 0x845   :  { %661 = vadd.xlane.f32.xlu1 %v660_v5 }
 0x856   :  { %3840 = vrot.lane.b32.xlu1 %v4350_v43, %s4149_s15 }
 0x85a   :  { %3835 = vrot.lane.b32.xlu0 %v4350_v43, %s4150_s1  ;;  %3845 = vrot.lane.b32.xlu1 %v4356_v44, %s4151_s27 }
 0x85e   :  { %958 = vrot.lane.b32.xlu0 %v4309_v24, %s4152_s16  ;;  %960 = vrot.lane.b32.xlu1 %v4316_v28, %s4152_s16 }
 0x8cd   :  { %v863_v7 = vpop.xlane.xlu0 %862 }
 0x8ce   :  { %v866_v9 = vpop.xlane.xlu1 %865  ;;  %3934 = vrcp.f32 %v863_v7 }
 0x8d1   :  { %v659_v12 = vpop.xlane.xlu0 %658 }
 0x8d2   :  { %3936 = vrcp.f32 %v659_v12  ;;  %v662_v13 = vpop.xlane.xlu1 %661 }
 0x8d3   :  { %3938 = vrcp.f32 %v662_v13 }
 0x8d4   :  { %3940 = vrcp.f32 %v866_v9 }
 0x8d5   :  { %v3836_v16 = vpop.permute.xlu0 %3835 }
 0x8d6   :  { %v3838_v18 = vunpack.i.h.bf16 %v3836_v16  ;;  %v3837_v19 = vunpack.i.l.bf16 %v3836_v16  ;;  %v3841_v20 = vpop.permute.xlu1 %3840 }
 0x8d7   :  { %v3843_v44 = vunpack.i.h.bf16 %v3841_v20  ;;  %v3842_v21 = vunpack.i.l.bf16 %v3841_v20  ;;  %v1194_v20 = vld [vmem:[#allocation7 + $0xe8] sm:$0xff] }
 0x8d8   :  { %v3649_v26 = vpack.c.bf16 %v3838_v18, %v3837_v19  ;;  %v3935_v29 = vpop.eup %3934  ;;  %v1193_v19 = vld [vmem:[#allocation7 + $0xe0] sm:$0xff] }
 0x8d9   :  { %v3659_v27 = vpack.c.bf16 %v3843_v44, %v3842_v21  ;;  %v869_v39 = vmul.f32 %v3935_v29, %v3927_v60  ;;  %v959_v42 = vpop.permute.xlu0 %958  ;;  %v3859_v60 = vpack.i.bf16 %v1196_v59, %v1195_v58  ;;  %v3854_v44 = vpack.i.bf16 %v1194_v20, %v1193_v19  ;;  %v1343_v19 = vld [vmem:[#allocation7 + $0xd0] sm:$0xff]  ;;  %v1344_v20 = vld [vmem:[#allocation7 + $0xd8] sm:$0xff] }
 0x8da   :  { %3650 = vmatprep.subr.bf16.mxu1 %v3649_v26  ;;  %v3846_v24 = vpop.permute.xlu1 %3845 }
 0x8db   :  { %3652 = vmatpush3.bf16.msra.mxu1 %v3649_v26  ;;  %v3848_v30 = vunpack.i.h.bf16 %v3846_v24  ;;  %v3847_v32 = vunpack.i.l.bf16 %v3846_v24 }
 0x8dc   :  { %v3937_v28 = vpop.eup %3936  ;;  %3660 = vmatprep.subr.bf16.mxu1 %v3659_v27 }
 0x8dd   :  { %v3939_v33 = vpop.eup %3938  ;;  %v665_v35 = vmul.f32 %v3937_v28, %v3931_v63  ;;  %v3663_v40 = vpack.c.bf16 %v3848_v30, %v3847_v32 }
 0x8de   :  { %v666_v36 = vmul.f32 %v3939_v33, %v3933_v2  ;;  %v3941_v38 = vpop.eup %3940  ;;  %v961_v45 = vpop.permute.xlu1 %960 }
 0x8df   :  { %3402 = vmatprep.mubr.msk.f32.mxu1 %vm440_vm5, %v665_v35  ;;  %v870_v41 = vmul.f32 %v3941_v38, %v3929_v61 }
 0x8e0   :  { %3403 = vmatmul.mubr.msk.f32.vlgmr.msra.gmra.mrb[8].mxu1 %vm440_vm5, %v666_v36 }
 0x8e1   :  { %3662 = vmatpush3.bf16.msra.mxu1 %v3659_v27  ;;  %3416 = vmatprep.mubr.msk.f32.mxu1 %vm440_vm5, %v869_v39 }
 0x8e2   :  { %3665 = vmatprep.subr.msk.bf16.mxu1 %vm4326_vm4, %v3663_v40 }
 0x8e4   :  { %3417 = vmatmul.mubr.msk.f32.vlgmr.msra.gmra.mrb[10].mxu1 %vm440_vm5, %v870_v41 }
 0x8e5   :  { %3423 = vmatprep.mubr.msk.f32.mxu1 %vm352_vm3, %v959_v42 }
 0x8ea   :  { %3668 = vmatpush3.bf16.xpose.msk.msra.mxu1 %vm4326_vm4, %v3663_v40 }
 0x8f1   :  { %3424 = vmatmul.mubr.msk.f32.vlgmr.msra.gmra.mrb[12].mxu1 %vm352_vm3, %v961_v45 }
 0x9b3   :  { %v3404_v46 = vpop.f32.mrb[8].mxu1 }
 0x9b4   :  { %v745_v47 = vpop.f32.mrb[9].mxu1 }
 0x9b7   :  { %v3418_v48 = vpop.f32.mrb[10].mxu1 }
 0x9b8   :  { %v949_v49 = vpop.f32.mrb[11].mxu1 }
 0x9c4   :  { %v3425_v50 = vpop.f32.mrb[12].mxu1 }
 0x9c5   :  { %v1050_v51 = vmul.f32 0.35355338, %v3425_v50  ;;  %v1040_v52 = vpop.f32.mrb[13].mxu1 }
 0x9c6   :  { %v1049_v53 = vmul.f32 0.35355338, %v1040_v52 }
 0x9c7   :  { %v1052_v54 = vadd.f32 %v1050_v51, %v4340_v34 }
 0x9c8   :  { %v1051_v55 = vadd.f32 %v1049_v53, %v4342_v37 }
 0x9c9   :  { %v1056_v56 = vsel %vm440_vm5, %v1052_v54, -inf }
 0x9ca   :  { %1057 = vmax.xlane.f32.xlu1 %v1056_v56  ;;  %v1053_v57 = vsel %vm440_vm5, %v1051_v55, -inf }
 0x9cb   :  { %1054 = vmax.xlane.f32.xlu0 %v1053_v57 }
 0x9db   :  { %3850 = vrot.lane.b32.xlu1 %v4350_v43, %s4153_s17 }
 0x9df   :  { %3860 = vrot.lane.b32.xlu1 %v3859_v60, %s4143_s25 }
 0x9e3   :  { %1164 = vrot.lane.b32.xlu1 %v745_v47, %s4137_s14 }
 0x9e7   :  { %1172 = vrot.lane.b32.xlu1 %v949_v49, %s4154_s18 }
 0xa57   :  { %v1058_v61 = vpop.xlane.xlu1 %1057 }
 0xa58   :  { %v1060_v62 = vsub.f32 %v1052_v54, %v1058_v61  ;;  %v1055_v63 = vpop.xlane.xlu0 %1054 }
 0xa59   :  { %v1059_v0 = vsub.f32 %v1051_v55, %v1055_v63 }
 0xa5a   :  { %v1063_v2 = vmul.f32 1.442695, %v1060_v62 }
 0xa5b   :  { %v1061_v4 = vmul.f32 1.442695, %v1059_v0  ;;  %v3851_v5 = vpop.permute.xlu1 %3850 }
 0xa5c   :  { %v3853_v7 = vunpack.i.h.bf16 %v3851_v5  ;;  %v3852_v9 = vunpack.i.l.bf16 %v3851_v5 }
 0xa5d   :  { %3942 = vpow2.f32 %v1061_v4 }
 0xa5e   :  { %v3669_v12 = vpack.c.bf16 %v3853_v7, %v3852_v9  ;;  %3944 = vpow2.f32 %v1063_v2 }
 0xa5f   :  { %v3861_v27 = vpop.permute.xlu1 %3860 }
 0xa60   :  { %3670 = vmatprep.subr.bf16.mxu1 %v3669_v12  ;;  %v3863_v24 = vunpack.i.h.bf16 %v3861_v27  ;;  %v3862_v29 = vunpack.i.l.bf16 %v3861_v27 }
 0xa61   :  { %3672 = vmatpush3.bf16.msra.mxu1 %v3669_v12 }
 0xa62   :  { %v3677_v35 = vpack.c.bf16 %v3863_v24, %v3862_v29 }
 0xa67   :  { %v3943_v43 = vpop.eup %3942 }
 0xa68   :  { %v1065_v13 = vsel %vm440_vm5, %v3943_v43, 0.0  ;;  %v3945_v16 = vpop.eup %3944 }
 0xa69   :  { %1066 = vadd.xlane.f32.xlu0 %v1065_v13  ;;  %v1068_v18 = vsel %vm440_vm5, %v3945_v16, 0.0 }
 0xa6d   :  { %1069 = vadd.xlane.f32.xlu0 %v1068_v18 }
 0xa83   :  { %3855 = vrot.lane.b32.xlu0 %v3854_v44, %s4143_s25  ;;  %v3685_v44 = vpack.c.bf16 %v1344_v20, %v1343_v19 }
 0xa87   :  { %1166 = vrot.lane.b32.xlu0 %v3404_v46, %s4137_s14  ;;  %v1165_v46 = vpop.permute.xlu1 %1164 }
 0xa88   :  { %v1186_v49 = vsel %vm352_vm3, %v4388_v25, %v1165_v46  ;;  %v3127_v25 = vld [vmem:[%s4744_s4 + $0xa] ss:$0 sm:$0xff] }
 0xa89   :  { %v1456_v46 = vld [vmem:[#allocation7 + $0x108] sm:$0xff] }
 0xa8b   :  { %1174 = vrot.lane.b32.xlu0 %v3418_v48, %s4154_s18  ;;  %v1173_v48 = vpop.permute.xlu1 %1172 }
 0xa8c   :  { %v1188_v51 = vsel %vm440_vm5, %v1186_v49, %v1173_v48  ;;  %v1458_v49 = vld [vmem:[#allocation7 + $0x118] sm:$0xff] }
 0xaf6   :  { %v1067_v21 = vpop.xlane.xlu0 %1066 }
 0xaf7   :  { %3946 = vrcp.f32 %v1067_v21 }
 0xafa   :  { %v1070_v26 = vpop.xlane.xlu0 %1069 }
 0xafb   :  { %3948 = vrcp.f32 %v1070_v26 }
 0xafe   :  { %v3856_v28 = vpop.permute.xlu0 %3855 }
 0xaff   :  { %v3858_v30 = vunpack.i.h.bf16 %v3856_v28  ;;  %v3857_v32 = vunpack.i.l.bf16 %v3856_v28 }
 0xb01   :  { %v3947_v33 = vpop.eup %3946  ;;  %v3673_v36 = vpack.c.bf16 %v3858_v30, %v3857_v32  ;;  %v3130_v32 = vld [vmem:[%s4744_s4 + $0xc] ss:$0 sm:$0xff] }
 0xb02   :  { %v1073_v38 = vmul.f32 %v3947_v33, %v3943_v43  ;;  %v1167_v45 = vpop.permute.xlu0 %1166 }
 0xb03   :  { %3674 = vmatprep.subr.bf16.mxu0 %v3673_v36  ;;  %v1187_v52 = vsel %vm352_vm3, %v4386_v23, %v1167_v45  ;;  %v1455_v45 = vld [vmem:[#allocation7 + $0x100] sm:$0xff] }
 0xb04   :  { %3430 = vmatprep.mubr.msk.f32.mxu1 %vm440_vm5, %v1073_v38  ;;  %3676 = vmatpush3.bf16.msra.mxu0 %v3673_v36  ;;  %v3131_v38 = vld [vmem:[%s4744_s4 + $0xd] ss:$0 sm:$0xff]  ;;  %v3689_v48 = vpack.c.bf16 %v1456_v46, %v1455_v45  ;;  %v1594_v45 = vld [vmem:[#allocation7 + $0x150] sm:$0xff]  ;;  %v1595_v46 = vld [vmem:[#allocation7 + $0x158] sm:$0xff] }
 0xb05   :  { %v3949_v39 = vpop.eup %3948  ;;  %3678 = vmatprep.subr.bf16.mxu0 %v3677_v35 }
 0xb06   :  { %v1074_v40 = vmul.f32 %v3949_v39, %v3945_v16  ;;  %v1175_v47 = vpop.permute.xlu0 %1174  ;;  %v1342_v16 = vld [vmem:[#allocation7 + $0xc8] sm:$0xff] }
 0xb07   :  { %v1189_v54 = vsel %vm440_vm5, %v1187_v52, %v1175_v47  ;;  %v1457_v47 = vld [vmem:[#allocation7 + $0x110] sm:$0xff]  ;;  %v1460_v52 = vld [vmem:[#allocation7 + $0x128] sm:$0xff] }
 0xb08   :  { %3431 = vmatmul.mubr.msk.f32.vlgmr.msra.gmra.mrb[14].mxu1 %vm440_vm5, %v1074_v40  ;;  %3680 = vmatpush3.bf16.msra.mxu0 %v3677_v35 }
 0xb09   :  { %3690 = vmatprep.subr.bf16.mxu0 %v3689_v48 }
 0xbdb   :  { %v3432_v41 = vpop.f32.mrb[14].mxu1 }
 0xbdc   :  { %1182 = vrot.lane.b32.xlu0 %v3432_v41, %s4155_s19  ;;  %v1153_v42 = vpop.f32.mrb[15].mxu1 }
 0xbdd   :  { %1180 = vrot.lane.b32.xlu1 %v1153_v42, %s4155_s19 }
 0xc4e   :  { %v1183_v50 = vpop.permute.xlu0 %1182 }
 0xc4f   :  { %v1181_v53 = vpop.permute.xlu1 %1180  ;;  %v1192_v56 = vsel %vm1190_vm6, %v1189_v54, %v1183_v50  ;;  %v3693_v50 = vpack.c.bf16 %v1458_v49, %v1457_v47  ;;  %v1461_v54 = vld [vmem:[#allocation7 + $0x130] sm:$0xff]  ;;  %v3709_v47 = vpack.c.bf16 %v1595_v46, %v1594_v45 }
 0xc50   :  { %v1191_v55 = vsel %vm1190_vm6, %v1188_v51, %v1181_v53  ;;  %v1459_v51 = vld [vmem:[#allocation7 + $0x120] sm:$0xff] }
 0xc51   :  { %3441 = vmatprep.mubr.msk.f32.mxu0 %vm175_vm2, %v1191_v55  ;;  %v3697_v53 = vpack.c.bf16 %v1460_v52, %v1459_v51  ;;  %v1462_v55 = vld [vmem:[#allocation7 + $0x138] sm:$0xff] }
 0xc52   :  { %3442 = vmatmul.mubr.msk.f32.vlgmr.msra.gmra.mrb[4].mxu0 %vm175_vm2, %v1192_v56  ;;  %v3701_v56 = vpack.c.bf16 %v1462_v55, %v1461_v54  ;;  %v3140_v55 = vld [vmem:[%s4744_s4 + $0xe] ss:$0 sm:$0xff] }
 0xc53   :  { %3692 = vmatpush3.bf16.msra.mxu0 %v3689_v48 }
 0xc54   :  { %3694 = vmatprep.subr.bf16.mxu0 %v3693_v50 }
 0xc57   :  { %3696 = vmatpush3.bf16.msra.mxu0 %v3693_v50 }
 0xc58   :  { %3698 = vmatprep.subr.bf16.mxu0 %v3697_v53 }
 0xc5b   :  { %3700 = vmatpush3.bf16.msra.mxu0 %v3697_v53 }
 0xc5c   :  { %3702 = vmatprep.subr.bf16.mxu0 %v3701_v56 }
 0xc5f   :  { %3704 = vmatpush3.bf16.msra.mxu0 %v3701_v56 }
 0xd25   :  { %v3443_v57 = vpop.f32.mrb[4].mxu0 }
 0xd26   :  { %v1296_v58 = vadd.f32 %v3443_v57, %v3127_v25  ;;  %v1290_v59 = vpop.f32.mrb[5].mxu0 }
 0xd27   :  { %v1291_v60 = vadd.f32 %v3127_v25, %v1290_v59  ;;  %v3132_v25 = vld [vmem:[%s4744_s4 + $0x9] ss:$0 sm:$0xff] }
 0xd28   :  { %v1300_v23 = vadd.f32 %v1296_v58, %v4271_v3 }
 0xd29   :  { %v1299_v61 = vadd.f32 %v1291_v60, %v4267_v1  ;;  %v1341_v1 = vld [vmem:[#allocation7 + $0xc0] sm:$0xff] }
 0xd2a   :  { %v1306_v62 = vsel %vm175_vm2, %v1300_v23, 0.0  ;;  %v3681_v18 = vpack.c.bf16 %v1342_v16, %v1341_v1  ;;  %v3137_v1 = vld [vmem:[%s4744_s4 + $0xb] ss:$0 sm:$0xff] }
 0xd2b   :  { %1307 = vadd.xlane.f32.xlu0 %v1306_v62  ;;  %v1303_v63 = vsel %vm175_vm2, %v1299_v61, 0.0 }
 0xd2c   :  { %1304 = vadd.xlane.f32.xlu1 %v1303_v63  ;;  %3682 = vmatprep.subr.bf16.mxu1 %v3681_v18 }
 0xd2d   :  { %3684 = vmatpush3.bf16.msra.mxu1 %v3681_v18 }
 0xd2e   :  { %3686 = vmatprep.subr.bf16.mxu1 %v3685_v44 }
 0xd31   :  { %3688 = vmatpush3.bf16.msra.mxu1 %v3685_v44 }
 0xdb8   :  { %v1308_v0 = vpop.xlane.xlu0 %1307 }
 0xdb9   :  { %v1310_v2 = vmul.f32 0.03125, %v1308_v0  ;;  %v1305_v4 = vpop.xlane.xlu1 %1304 }
 0xdba   :  { %v1309_v5 = vmul.f32 0.03125, %v1305_v4 }
 0xdbb   :  { %v1312_v7 = vsub.f32 %v1300_v23, %v1310_v2 }
 0xdbc   :  { %v1311_v9 = vsub.f32 %v1299_v61, %v1309_v5 }
 0xdbd   :  { %v1314_v12 = vmul.f32 %v1312_v7, %v1312_v7 }
 0xdbe   :  { %v1313_v43 = vmul.f32 %v1311_v9, %v1311_v9 }
 0xdbf   :  { %v1318_v13 = vsel %vm175_vm2, %v1314_v12, 0.0 }
 0xdc0   :  { %1319 = vadd.xlane.f32.xlu1 %v1318_v13  ;;  %v1315_v3 = vsel %vm175_vm2, %v1313_v43, 0.0 }
 0xdc1   :  { %1316 = vadd.xlane.f32.xlu0 %v1315_v3 }
 0xe4d   :  { %v1320_v21 = vpop.xlane.xlu1 %1319 }
 0xe4e   :  { %v1322_v26 = vmul.f32 0.03125, %v1320_v21  ;;  %v1317_v27 = vpop.xlane.xlu0 %1316 }
 0xe4f   :  { %v1321_v24 = vmul.f32 0.03125, %v1317_v27 }
 0xe50   :  { %v1324_v29 = vadd.f32 1e-06, %v1322_v26 }
 0xe51   :  { %v1323_v28 = vadd.f32 1e-06, %v1321_v24 }
 0xe52   :  { %3950 = vrsqrt.f32 %v1324_v29 }
 0xe53   :  { %3952 = vrsqrt.f32 %v1323_v28 }
 0xe5c   :  { %v3951_v30 = vpop.eup %3950 }
 0xe5d   :  { %v3953_v33 = vpop.eup %3952  ;;  %v1328_v35 = vmul.f32 %v3951_v30, %v1312_v7 }
 0xe5e   :  { %v1327_v36 = vmul.f32 %v3953_v33, %v1311_v9 }
 0xe5f   :  { %v1334_v39 = vmul.f32 %v3130_v32, %v1328_v35 }
 0xe60   :  { %v1333_v40 = vmul.f32 %v3130_v32, %v1327_v36 }
 0xe61   :  { %v1340_v42 = vadd.f32 %v3131_v38, %v1334_v39 }
 0xe62   :  { %v1339_v41 = vadd.f32 %v3131_v38, %v1333_v40  ;;  %v1592_v40 = vld [vmem:[#allocation7 + $0x140] sm:$0xff] }
 0xe64   :  { %3452 = vmatprep.mubr.msk.f32.mxu1 %vm175_vm2, %v1339_v41 }
 0xe65   :  { %3453 = vmatmul.mubr.msk.f32.vlgmr.msra.gmra.mrb[16].mxu1 %vm175_vm2, %v1340_v42 }
 0xf38   :  { %v3454_v57 = vpop.f32.mrb[16].mxu1 }
 0xf39   :  { %v1428_v58 = vadd.f32 %v3454_v57, %v3132_v25  ;;  %v1422_v59 = vpop.f32.mrb[17].mxu1 }
 0xf3a   :  { %v1423_v60 = vadd.f32 %v3132_v25, %v1422_v59 }
 0xf3b   :  { %1449 = vrot.lane.b32.xlu1 %v1428_v58, %s4144_s8  ;;  %v3136_v61 = vmul.f32 -1.442695, %v1428_v58 }
 0xf3c   :  { %1447 = vrot.lane.b32.xlu0 %v1423_v60, %s4144_s8  ;;  %v3135_v23 = vmul.f32 -1.442695, %v1423_v60 }
 0xf3e   :  { %3954 = vpow2.f32 %v3135_v23 }
 0xf3f   :  { %3956 = vpow2.f32 %v3136_v61 }
 0xf48   :  { %v3955_v62 = vpop.eup %3954 }
 0xf49   :  { %v3957_v63 = vpop.eup %3956  ;;  %v1437_v0 = vadd.f32 1.0, %v3955_v62  ;;  %v3142_v62 = vld [vmem:[%s4744_s4 + $0x10] ss:$0 sm:$0xff] }
 0xf4a   :  { %v1438_v2 = vadd.f32 1.0, %v3957_v63 }
 0xf4b   :  { %3958 = vrcp.f32 %v1437_v0 }
 0xf4c   :  { %3960 = vrcp.f32 %v1438_v2 }
 0xf55   :  { %v3959_v4 = vpop.eup %3958 }
 0xf56   :  { %v3961_v5 = vpop.eup %3960  ;;  %v1443_v9 = vmul.f32 %v3959_v4, %v1423_v60 }
 0xf57   :  { %v1444_v12 = vmul.f32 %v3961_v5, %v1428_v58  ;;  %v3141_v58 = vld [vmem:[%s4744_s4 + $0xf] ss:$0 sm:$0xff] }
 0xfad   :  { %v1450_v7 = vpop.permute.xlu1 %1449 }
 0xfae   :  { %v1448_v43 = vpop.permute.xlu0 %1447  ;;  %v1454_v3 = vmul.f32 %v1450_v7, %v1444_v12 }
 0xfaf   :  { %v1453_v13 = vmul.f32 %v1448_v43, %v1443_v9 }
 0xfb1   :  { %3471 = vmatprep.mubr.msk.f32.mxu0 %vm1468_vm7, %v1453_v13 }
 0xfb2   :  { %3472 = vmatmul.mubr.msk.f32.vlgmr.msra.gmra.mrb[6].mxu0 %vm1468_vm7, %v1454_v3 }
0x1085   :  { %v3473_v16 = vpop.f32.mrb[6].mxu0 }
0x1086   :  { %v1547_v18 = vadd.f32 %v3473_v16, %v3137_v1  ;;  %v1541_v19 = vpop.f32.mrb[7].mxu0 }
0x1087   :  { %v1542_v20 = vadd.f32 %v3137_v1, %v1541_v19 }
0x1088   :  { %v1551_v44 = vadd.f32 %v1547_v18, %v1340_v42 }
0x1089   :  { %v1550_v21 = vadd.f32 %v1542_v20, %v1339_v41  ;;  %v1593_v41 = vld [vmem:[#allocation7 + $0x148] sm:$0xff] }
0x108a   :  { %v1557_v26 = vsel %vm175_vm2, %v1551_v44, 0.0  ;;  %v3705_v42 = vpack.c.bf16 %v1593_v41, %v1592_v40 }
0x108b   :  { %1558 = vadd.xlane.f32.xlu0 %v1557_v26  ;;  %v1554_v27 = vsel %vm175_vm2, %v1550_v21, 0.0 }
0x108c   :  { %1555 = vadd.xlane.f32.xlu1 %v1554_v27  ;;  %3706 = vmatprep.subr.bf16.mxu1 %v3705_v42 }
0x108d   :  { %3708 = vmatpush3.bf16.msra.mxu1 %v3705_v42 }
0x108e   :  { %3710 = vmatprep.subr.bf16.mxu1 %v3709_v47 }
0x1091   :  { %3712 = vmatpush3.bf16.msra.mxu1 %v3709_v47 }
0x1118   :  { %v1559_v24 = vpop.xlane.xlu0 %1558 }
0x1119   :  { %v1561_v29 = vmul.f32 0.03125, %v1559_v24  ;;  %v1556_v28 = vpop.xlane.xlu1 %1555 }
0x111a   :  { %v1560_v30 = vmul.f32 0.03125, %v1556_v28 }
0x111b   :  { %v1563_v32 = vsub.f32 %v1551_v44, %v1561_v29 }
0x111c   :  { %v1562_v33 = vsub.f32 %v1550_v21, %v1560_v30 }
0x111d   :  { %v1565_v35 = vmul.f32 %v1563_v32, %v1563_v32 }
0x111e   :  { %v1564_v36 = vmul.f32 %v1562_v33, %v1562_v33 }
0x111f   :  { %v1569_v38 = vsel %vm175_vm2, %v1565_v35, 0.0 }
0x1120   :  { %1570 = vadd.xlane.f32.xlu1 %v1569_v38  ;;  %v1566_v39 = vsel %vm175_vm2, %v1564_v36, 0.0 }
0x1121   :  { %1567 = vadd.xlane.f32.xlu0 %v1566_v39 }
0x11ad   :  { %v1571_v48 = vpop.xlane.xlu1 %1570 }
0x11ae   :  { %v1573_v49 = vmul.f32 0.03125, %v1571_v48  ;;  %v1568_v50 = vpop.xlane.xlu0 %1567 }
0x11af   :  { %v1572_v51 = vmul.f32 0.03125, %v1568_v50 }
0x11b0   :  { %v1575_v52 = vadd.f32 1e-06, %v1573_v49 }
0x11b1   :  { %v1574_v53 = vadd.f32 1e-06, %v1572_v51 }
0x11b2   :  { %3962 = vrsqrt.f32 %v1575_v52 }
0x11b3   :  { %3964 = vrsqrt.f32 %v1574_v53 }
0x11bc   :  { %v3963_v54 = vpop.eup %3962 }
0x11bd   :  { %v3965_v56 = vpop.eup %3964  ;;  %v1579_v25 = vmul.f32 %v3963_v54, %v1563_v32 }
0x11be   :  { %v1578_v57 = vmul.f32 %v3965_v56, %v1562_v33 }
0x11bf   :  { %v1585_v59 = vmul.f32 %v3140_v55, %v1579_v25 }
0x11c0   :  { %v1584_v60 = vmul.f32 %v3140_v55, %v1578_v57 }
0x11c1   :  { %v4489_v61 = vadd.f32 %v3141_v58, %v1585_v59 }
0x11c2   :  { %v4487_v23 = vadd.f32 %v3141_v58, %v1584_v60 }
0x11c4   :  { %3482 = vmatprep.mubr.msk.f32.mxu1 %vm175_vm2, %v4487_v23 }
0x11c5   :  { %3483 = vmatmul.mubr.msk.f32.vlgmr.msra.gmra.mrb[18].mxu1 %vm175_vm2, %v4489_v61 }
0x1298   :  { %v3484_v63 = vpop.f32.mrb[18].mxu1 }
0x1299   :  { %v4498_v0 = vadd.f32 %v3484_v63, %v3142_v62  ;;  %v1673_v2 = vpop.f32.mrb[19].mxu1 }
0x129a   :  { %v4500_v4 = vadd.f32 %v3142_v62, %v1673_v2 }
0x129b   :  { %1684 = vrot.lane.b32.xlu1 %v4498_v0, %s4141_s24  ;;  %v1691_v13 = vmul.f32 %v4498_v0, %v4301_v17 }
0x129c   :  { %1682 = vrot.lane.b32.xlu0 %v4500_v4, %s4141_s24  ;;  %v1690_v12 = vmul.f32 %v4500_v4, %v4292_v11 }
0x129f   :  { %1686 = vrot.lane.b32.xlu1 %v4500_v4, %s4142_s2 }
0x12a0   :  { %1688 = vrot.lane.b32.xlu0 %v4498_v0, %s4142_s2 }
0x130d   :  { %v1685_v5 = vpop.permute.xlu1 %1684 }
0x130e   :  { %v1683_v7 = vpop.permute.xlu0 %1682  ;;  %v1693_v9 = vmul.f32 %v1685_v5, %v4295_v14 }
0x130f   :  { %v1692_v43 = vmul.f32 %v1683_v7, %v4290_v10 }
0x1310   :  { %v1695_v19 = vadd.f32 %v1693_v9, %v1691_v13 }
0x1311   :  { %v1694_v3 = vadd.f32 %v1692_v43, %v1690_v12  ;;  %v1687_v1 = vpop.permute.xlu1 %1686  ;;  %v4562_v43 = vpack.i.bf16 %v4498_v0, %v4500_v4 }
0x1312   :  { %v1696_v16 = vmul.f32 %v1687_v1, %v4297_v15  ;;  %v1689_v18 = vpop.permute.xlu0 %1688 }
0x1313   :  { %v1697_v20 = vmul.f32 %v1689_v18, %v4305_v22 }
0x1314   :  { %v4518_v44 = vadd.f32 %v1696_v16, %v1694_v3 }
0x1315   :  { %v4520_v21 = vadd.f32 %v1697_v20, %v1695_v19 }
0x1316   :  { %3489 = vmatprep.mubr.msk.f32.mxu1 %vm352_vm3, %v4518_v44 }
0x1317   :  { %v4526_v10 = vpack.i.bf16 %v4520_v21, %v4518_v44 }
0x1319   :  { %3870 = vrot.lane.b32.xlu0 %v4526_v10, %s4145_s9  ;;  %3865 = vrot.lane.b32.xlu1 %v4526_v10, %s4143_s25 }
0x131d   :  { %1924 = vrot.lane.b32.xlu0 %v4520_v21, %s4146_s10  ;;  %1922 = vrot.lane.b32.xlu1 %v4518_v44, %s4146_s10 }
0x138b   :  { %v3871_v11 = vpop.permute.xlu0 %3870  ;;  %v3866_v14 = vpop.permute.xlu1 %3865 }
0x138c   :  { %v3873_v15 = vunpack.i.h.bf16 %v3871_v11  ;;  %v3872_v17 = vunpack.i.l.bf16 %v3871_v11  ;;  %v3868_v22 = vunpack.i.h.bf16 %v3866_v14  ;;  %v3867_v26 = vunpack.i.l.bf16 %v3866_v14 }
0x138e   :  { %v3713_v27 = vpack.c.bf16 %v3868_v22, %v3867_v26  ;;  %v3723_v24 = vpack.c.bf16 %v3873_v15, %v3872_v17 }
0x138f   :  { %v1923_v29 = vpop.permute.xlu1 %1922  ;;  %v1925_v28 = vpop.permute.xlu0 %1924 }
0x1390   :  { %3715 = vmatprep.subr.msk.bf16.mxu1 %vm4326_vm4, %v3713_v27 }
0x1391   :  { %3718 = vmatpush3.bf16.xpose.msk.msra.mxu1 %vm4326_vm4, %v3713_v27 }
0x1392   :  { %3725 = vmatprep.subr.msk.bf16.mxu1 %vm4326_vm4, %v3723_v24 }
0x1398   :  { %3490 = vmatmul.mubr.msk.f32.vlgmr.msra.gmra.mrb[20].mxu1 %vm352_vm3, %v4520_v21 }
0x1399   :  { %3728 = vmatpush3.bf16.xpose.msk.msra.mxu1 %vm4326_vm4, %v3723_v24  ;;  %3503 = vmatprep.mubr.msk.f32.mxu1 %vm352_vm3, %v1923_v29 }
0x13a0   :  { %3504 = vmatmul.mubr.msk.f32.vlgmr.msra.gmra.mrb[22].mxu1 %vm352_vm3, %v1925_v28 }
0x146b   :  { %v3491_v30 = vpop.f32.mrb[20].mxu1 }
0x146c   :  { %v1810_v32 = vmul.f32 0.35355338, %v3491_v30  ;;  %v1800_v33 = vpop.f32.mrb[21].mxu1 }
0x146d   :  { %v1809_v35 = vmul.f32 0.35355338, %v1800_v33 }
0x146e   :  { %v1812_v36 = vadd.f32 %v1810_v32, %v4340_v34 }
0x146f   :  { %v1811_v38 = vadd.f32 %v1809_v35, %v4342_v37 }
0x1470   :  { %v1816_v39 = vsel %vm440_vm5, %v1812_v36, -inf }
0x1471   :  { %1817 = vmax.xlane.f32.xlu0 %v1816_v39  ;;  %v1813_v40 = vsel %vm440_vm5, %v1811_v38, -inf }
0x1472   :  { %1814 = vmax.xlane.f32.xlu1 %v1813_v40 }
0x1473   :  { %v3505_v41 = vpop.f32.mrb[22].mxu1 }
0x1474   :  { %v2014_v42 = vmul.f32 0.35355338, %v3505_v41  ;;  %v2004_v45 = vpop.f32.mrb[23].mxu1 }
0x1475   :  { %v2013_v46 = vmul.f32 0.35355338, %v2004_v45 }
0x1476   :  { %v2016_v47 = vadd.f32 %v2014_v42, %v4340_v34 }
0x1477   :  { %v2015_v48 = vadd.f32 %v2013_v46, %v4342_v37 }
0x1478   :  { %v2020_v49 = vsel %vm440_vm5, %v2016_v47, -inf }
0x1479   :  { %2021 = vmax.xlane.f32.xlu1 %v2020_v49  ;;  %v2017_v50 = vsel %vm440_vm5, %v2015_v48, -inf }
0x147a   :  { %2018 = vmax.xlane.f32.xlu0 %v2017_v50 }
0x14fe   :  { %v1818_v51 = vpop.xlane.xlu0 %1817 }
0x14ff   :  { %v1820_v52 = vsub.f32 %v1812_v36, %v1818_v51  ;;  %v1815_v53 = vpop.xlane.xlu1 %1814 }
0x1500   :  { %v1819_v54 = vsub.f32 %v1811_v38, %v1815_v53 }
0x1501   :  { %v1823_v55 = vmul.f32 1.442695, %v1820_v52  ;;  %v4014_v52 = vld [vmem:[#allocation2 + $0x8] sm:$0xff] }
0x1502   :  { %v1821_v56 = vmul.f32 1.442695, %v1819_v54  ;;  %v4015_v54 = vld [vmem:[#allocation2] sm:$0xff] }
0x1503   :  { %3966 = vpow2.f32 %v1823_v55 }
0x1504   :  { %3968 = vpow2.f32 %v1821_v56 }
0x1506   :  { %v2022_v25 = vpop.xlane.xlu1 %2021 }
0x1507   :  { %v2024_v57 = vsub.f32 %v2016_v47, %v2022_v25  ;;  %v2019_v58 = vpop.xlane.xlu0 %2018 }
0x1508   :  { %v2023_v34 = vsub.f32 %v2015_v48, %v2019_v58 }
0x1509   :  { %v2027_v59 = vmul.f32 1.442695, %v2024_v57 }
0x150a   :  { %v2025_v37 = vmul.f32 1.442695, %v2023_v34 }
0x150b   :  { %3970 = vpow2.f32 %v2027_v59 }
0x150c   :  { %3972 = vpow2.f32 %v2025_v37 }
0x150d   :  { %v3967_v60 = vpop.eup %3966 }
0x150e   :  { %v3969_v62 = vpop.eup %3968  ;;  %v1828_v63 = vsel %vm440_vm5, %v3967_v60, 0.0 }
0x150f   :  { %1829 = vadd.xlane.f32.xlu1 %v1828_v63  ;;  %v1825_v2 = vsel %vm440_vm5, %v3969_v62, 0.0 }
0x1510   :  { %1826 = vadd.xlane.f32.xlu0 %v1825_v2 }
0x1515   :  { %v3971_v5 = vpop.eup %3970 }
0x1516   :  { %v3973_v7 = vpop.eup %3972  ;;  %v2032_v9 = vsel %vm440_vm5, %v3971_v5, 0.0 }
0x1517   :  { %2033 = vadd.xlane.f32.xlu1 %v2032_v9  ;;  %v2029_v12 = vsel %vm440_vm5, %v3973_v7, 0.0 }
0x1518   :  { %2030 = vadd.xlane.f32.xlu0 %v2029_v12 }
0x1528   :  { %3880 = vrot.lane.b32.xlu1 %v4562_v43, %s4150_s1 }
0x152c   :  { %3885 = vrot.lane.b32.xlu1 %v4526_v10, %s4148_s12 }
0x152e   :  { %3875 = vrot.lane.b32.xlu0 %v4562_v43, %s4144_s8 }
0x1530   :  { %2128 = vrot.lane.b32.xlu1 %v4520_v21, %s4147_s11 }
0x1532   :  { %2126 = vrot.lane.b32.xlu0 %v4518_v44, %s4147_s11 }
0x159c   :  { %v1830_v3 = vpop.xlane.xlu1 %1829 }
0x159d   :  { %v1827_v13 = vpop.xlane.xlu0 %1826 }
0x159e   :  { %3974 = vrcp.f32 %v1827_v13 }
0x159f   :  { %3976 = vrcp.f32 %v1830_v3 }
0x15a4   :  { %v2034_v1 = vpop.xlane.xlu1 %2033 }
0x15a5   :  { %v2031_v16 = vpop.xlane.xlu0 %2030 }
0x15a6   :  { %3978 = vrcp.f32 %v2031_v16 }
0x15a7   :  { %3980 = vrcp.f32 %v2034_v1 }
0x15a8   :  { %v3975_v18 = vpop.eup %3974  ;;  %v3881_v19 = vpop.permute.xlu1 %3880 }
0x15a9   :  { %v3876_v20 = vpop.permute.xlu0 %3875  ;;  %v1833_v11 = vmul.f32 %v3975_v18, %v3969_v62  ;;  %v3883_v14 = vunpack.i.h.bf16 %v3881_v19  ;;  %v3882_v15 = vunpack.i.l.bf16 %v3881_v19  ;;  %v3977_v24 = vpop.eup %3976 }
0x15aa   :  { %v3878_v17 = vunpack.i.h.bf16 %v3876_v20  ;;  %v3877_v22 = vunpack.i.l.bf16 %v3876_v20  ;;  %v1834_v33 = vmul.f32 %v3977_v24, %v3967_v60 }
0x15ab   :  { %3496 = vmatprep.mubr.msk.f32.mxu0 %vm440_vm5, %v1833_v11  ;;  %v3729_v29 = vpack.c.bf16 %v3883_v14, %v3882_v15 }
0x15ac   :  { %v3719_v26 = vpack.c.bf16 %v3878_v17, %v3877_v22  ;;  %v3886_v27 = vpop.permute.xlu1 %3885 }
0x15ad   :  { %v3888_v28 = vunpack.i.h.bf16 %v3886_v27  ;;  %v3887_v30 = vunpack.i.l.bf16 %v3886_v27  ;;  %v2127_v40 = vpop.permute.xlu0 %2126 }
0x15ae   :  { %3720 = vmatprep.subr.bf16.mxu0 %v3719_v26 }
0x15af   :  { %3722 = vmatpush3.bf16.msra.mxu0 %v3719_v26  ;;  %v3733_v38 = vpack.c.bf16 %v3888_v28, %v3887_v30 }
0x15b0   :  { %v3979_v32 = vpop.eup %3978  ;;  %3730 = vmatprep.subr.bf16.mxu0 %v3729_v29  ;;  %v2129_v41 = vpop.permute.xlu1 %2128 }
0x15b1   :  { %v3981_v35 = vpop.eup %3980  ;;  %v2037_v36 = vmul.f32 %v3979_v32, %v3973_v7 }
0x15b2   :  { %3497 = vmatmul.mubr.msk.f32.vlgmr.msra.gmra.mrb[8].mxu0 %vm440_vm5, %v1834_v33  ;;  %v2038_v39 = vmul.f32 %v3981_v35, %v3971_v5 }
0x15b3   :  { %3732 = vmatpush3.bf16.msra.mxu0 %v3729_v29  ;;  %3510 = vmatprep.mubr.msk.f32.mxu0 %vm440_vm5, %v2037_v36 }
0x15b4   :  { %3735 = vmatprep.subr.msk.bf16.mxu0 %vm4326_vm4, %v3733_v38 }
0x15b6   :  { %3511 = vmatmul.mubr.msk.f32.vlgmr.msra.gmra.mrb[10].mxu0 %vm440_vm5, %v2038_v39 }
0x15b7   :  { %3517 = vmatprep.mubr.msk.f32.mxu0 %vm352_vm3, %v2127_v40 }
0x15bc   :  { %3738 = vmatpush3.bf16.xpose.msk.msra.mxu0 %vm4326_vm4, %v3733_v38  ;;  %v2567_v38 = vld [vmem:[#allocation7 + $0x198] sm:$0xff] }
0x15bd   :  { %v3909_v39 = vpack.i.bf16 %v2567_v38, %v2566_v31 }
0x15c3   :  { %3518 = vmatmul.mubr.msk.f32.vlgmr.msra.gmra.mrb[12].mxu0 %vm352_vm3, %v2129_v41 }
0x1685   :  { %v4584_v42 = vpop.f32.mrb[8].mxu0 }
0x1686   :  { %v4586_v45 = vpop.f32.mrb[9].mxu0 }
0x1689   :  { %v4588_v46 = vpop.f32.mrb[10].mxu0 }
0x168a   :  { %v4590_v47 = vpop.f32.mrb[11].mxu0 }
0x1696   :  { %v3519_v48 = vpop.f32.mrb[12].mxu0 }
0x1697   :  { %v2218_v49 = vmul.f32 0.35355338, %v3519_v48  ;;  %v2208_v50 = vpop.f32.mrb[13].mxu0 }
0x1698   :  { %v2217_v51 = vmul.f32 0.35355338, %v2208_v50 }
0x1699   :  { %v2220_v53 = vadd.f32 %v4014_v52, %v2218_v49 }
0x169a   :  { %v2219_v55 = vadd.f32 %v4015_v54, %v2217_v51 }
0x169b   :  { %v2224_v56 = vsel %vm440_vm5, %v2220_v53, -inf }
0x169c   :  { %2225 = vmax.xlane.f32.xlu1 %v2224_v56  ;;  %v2221_v25 = vsel %vm440_vm5, %v2219_v55, -inf }
0x169d   :  { %2222 = vmax.xlane.f32.xlu0 %v2221_v25 }
0x16ad   :  { %3890 = vrot.lane.b32.xlu1 %v4562_v43, %s4149_s15 }
0x16b1   :  { %2330 = vrot.lane.b32.xlu1 %v4518_v44, %s4152_s16 }
0x16b5   :  { %2332 = vrot.lane.b32.xlu1 %v4520_v21, %s4152_s16  ;;  %s4156_s16 = smov 32  }
0x1729   :  { %v2226_v57 = vpop.xlane.xlu1 %2225 }
0x172a   :  { %v2228_v58 = vsub.f32 %v2220_v53, %v2226_v57  ;;  %v2223_v34 = vpop.xlane.xlu0 %2222  ;;  %v2564_v57 = vld [vmem:[#allocation7 + $0x180] sm:$0xff] }
0x172b   :  { %v2227_v59 = vsub.f32 %v2219_v55, %v2223_v34 }
0x172c   :  { %v2231_v37 = vmul.f32 1.442695, %v2228_v58  ;;  %v2565_v58 = vld [vmem:[#allocation7 + $0x188] sm:$0xff] }
0x172d   :  { %v2229_v60 = vmul.f32 1.442695, %v2227_v59  ;;  %v3891_v62 = vpop.permute.xlu1 %3890  ;;  %v3904_v34 = vpack.i.bf16 %v2565_v58, %v2564_v57 }
0x172e   :  { %3982 = vpow2.f32 %v2231_v37  ;;  %v3893_v63 = vunpack.i.h.bf16 %v3891_v62  ;;  %v3892_v2 = vunpack.i.l.bf16 %v3891_v62 }
0x172f   :  { %3984 = vpow2.f32 %v2229_v60 }
0x1730   :  { %v3739_v5 = vpack.c.bf16 %v3893_v63, %v3892_v2 }
0x1731   :  { %v2331_v22 = vpop.permute.xlu1 %2330 }
0x1732   :  { %3740 = vmatprep.subr.bf16.mxu1 %v3739_v5 }
0x1733   :  { %3742 = vmatpush3.bf16.msra.mxu1 %v3739_v5 }
0x1738   :  { %v3983_v7 = vpop.eup %3982 }
0x1739   :  { %v2236_v9 = vsel %vm440_vm5, %v3983_v7, 0.0  ;;  %v3985_v12 = vpop.eup %3984 }
0x173a   :  { %2237 = vadd.xlane.f32.xlu0 %v2236_v9  ;;  %v2233_v13 = vsel %vm440_vm5, %v3985_v12, 0.0 }
0x173e   :  { %2234 = vadd.xlane.f32.xlu0 %v2233_v13 }
0x1754   :  { %3895 = vrot.lane.b32.xlu0 %v4526_v10, %s4151_s27  ;;  %v2333_v10 = vpop.permute.xlu1 %2332 }
0x17c7   :  { %v2238_v3 = vpop.xlane.xlu0 %2237 }
0x17c8   :  { %3986 = vrcp.f32 %v2238_v3 }
0x17cb   :  { %v2235_v1 = vpop.xlane.xlu0 %2234 }
0x17cc   :  { %3988 = vrcp.f32 %v2235_v1 }
0x17cf   :  { %v3896_v16 = vpop.permute.xlu0 %3895 }
0x17d0   :  { %v3898_v18 = vunpack.i.h.bf16 %v3896_v16  ;;  %v3897_v19 = vunpack.i.l.bf16 %v3896_v16 }
0x17d2   :  { %v3743_v20 = vpack.c.bf16 %v3898_v18, %v3897_v19  ;;  %v3987_v11 = vpop.eup %3986 }
0x17d3   :  { %v2242_v17 = vmul.f32 %v3987_v11, %v3983_v7 }
0x17d4   :  { %3745 = vmatprep.subr.msk.bf16.mxu1 %vm4326_vm4, %v3743_v20 }
0x17d6   :  { %v3989_v14 = vpop.eup %3988 }
0x17d7   :  { %v2241_v15 = vmul.f32 %v3989_v14, %v3985_v12 }
0x17d9   :  { %3524 = vmatprep.mubr.msk.f32.mxu1 %vm440_vm5, %v2241_v15 }
0x17da   :  { %3525 = vmatmul.mubr.msk.f32.vlgmr.msra.gmra.mrb[24].mxu1 %vm440_vm5, %v2242_v17 }
0x17db   :  { %3748 = vmatpush3.bf16.xpose.msk.msra.mxu1 %vm4326_vm4, %v3743_v20  ;;  %3531 = vmatprep.mubr.msk.f32.mxu1 %vm352_vm3, %v2331_v22 }
0x17e2   :  { %3532 = vmatmul.mubr.msk.f32.vlgmr.msra.gmra.mrb[26].mxu1 %vm352_vm3, %v2333_v10 }
0x18ad   :  { %v3526_v26 = vpop.f32.mrb[24].mxu1 }
0x18ae   :  { %v2321_v27 = vpop.f32.mrb[25].mxu1 }
0x18b5   :  { %v3533_v24 = vpop.f32.mrb[26].mxu1 }
0x18b6   :  { %v2422_v29 = vmul.f32 0.35355338, %v3533_v24  ;;  %v2412_v28 = vpop.f32.mrb[27].mxu1 }
0x18b7   :  { %v2421_v30 = vmul.f32 0.35355338, %v2412_v28 }
0x18b8   :  { %v2424_v32 = vadd.f32 %v4014_v52, %v2422_v29 }
0x18b9   :  { %v2423_v33 = vadd.f32 %v4015_v54, %v2421_v30 }
0x18ba   :  { %v2428_v35 = vsel %vm440_vm5, %v2424_v32, -inf }
0x18bb   :  { %2429 = vmax.xlane.f32.xlu1 %v2428_v35  ;;  %v2425_v36 = vsel %vm440_vm5, %v2423_v33, -inf }
0x18bc   :  { %2426 = vmax.xlane.f32.xlu0 %v2425_v36 }
0x18cc   :  { %3900 = vrot.lane.b32.xlu1 %v4562_v43, %s4153_s17 }
0x18d0   :  { %3910 = vrot.lane.b32.xlu1 %v3909_v39, %s4143_s25 }
0x18d4   :  { %2536 = vrot.lane.b32.xlu1 %v4590_v47, %s4137_s14 }
0x18d8   :  { %2544 = vrot.lane.b32.xlu1 %v2321_v27, %s4154_s18 }
0x1948   :  { %v2430_v40 = vpop.xlane.xlu1 %2429 }
0x1949   :  { %v2432_v41 = vsub.f32 %v2424_v32, %v2430_v40  ;;  %v2427_v48 = vpop.xlane.xlu0 %2426 }
0x194a   :  { %v2431_v49 = vsub.f32 %v2423_v33, %v2427_v48 }
0x194b   :  { %v2435_v50 = vmul.f32 1.442695, %v2432_v41 }
0x194c   :  { %v2433_v51 = vmul.f32 1.442695, %v2431_v49  ;;  %v3901_v52 = vpop.permute.xlu1 %3900 }
0x194d   :  { %v3903_v53 = vunpack.i.h.bf16 %v3901_v52  ;;  %v3902_v54 = vunpack.i.l.bf16 %v3901_v52 }
0x194e   :  { %3990 = vpow2.f32 %v2433_v51 }
0x194f   :  { %v3749_v55 = vpack.c.bf16 %v3903_v53, %v3902_v54  ;;  %3992 = vpow2.f32 %v2435_v50  ;;  %v2713_v53 = vld [vmem:[#allocation7 + $0x168] sm:$0xff] }
0x1950   :  { %v3911_v5 = vpop.permute.xlu1 %3910 }
0x1951   :  { %3750 = vmatprep.subr.bf16.mxu0 %v3749_v55  ;;  %v3913_v9 = vunpack.i.h.bf16 %v3911_v5  ;;  %v3912_v12 = vunpack.i.l.bf16 %v3911_v5  ;;  %v3173_v5 = vld [vmem:[%s4744_s4 + $0x15] ss:$0 sm:$0xff] }
0x1952   :  { %3752 = vmatpush3.bf16.msra.mxu0 %v3749_v55  ;;  %v2714_v55 = vld [vmem:[#allocation7 + $0x170] sm:$0xff] }
0x1954   :  { %v2537_v20 = vpop.permute.xlu1 %2536 }
0x1955   :  { %v2558_v15 = vsel %vm352_vm3, %v4586_v45, %v2537_v20  ;;  %v3169_v45 = vld [vmem:[%s4744_s4 + $0x12] ss:$0 sm:$0xff]  ;;  %v2830_v20 = vld [vmem:[#allocation7 + $0x1c0] sm:$0xff] }
0x1958   :  { %v3991_v43 = vpop.eup %3990  ;;  %v2545_v14 = vpop.permute.xlu1 %2544 }
0x1959   :  { %v2437_v56 = vsel %vm440_vm5, %v3991_v43, 0.0  ;;  %v3993_v47 = vpop.eup %3992  ;;  %v2560_v22 = vsel %vm440_vm5, %v2558_v15, %v2545_v14  ;;  %v2832_v15 = vld [vmem:[#allocation7 + $0x1d0] sm:$0xff] }
0x195a   :  { %2438 = vadd.xlane.f32.xlu0 %v2437_v56  ;;  %v2440_v25 = vsel %vm440_vm5, %v3993_v47, 0.0 }
0x195e   :  { %2441 = vadd.xlane.f32.xlu0 %v2440_v25 }
0x1974   :  { %3905 = vrot.lane.b32.xlu0 %v3904_v34, %s4143_s25 }
0x1978   :  { %2538 = vrot.lane.b32.xlu0 %v4588_v46, %s4137_s14  ;;  %v3757_v46 = vpack.c.bf16 %v3913_v9, %v3912_v12 }
0x197c   :  { %2546 = vrot.lane.b32.xlu0 %v3526_v26, %s4154_s18 }
0x19e7   :  { %v2439_v59 = vpop.xlane.xlu0 %2438 }
0x19e8   :  { %3994 = vrcp.f32 %v2439_v59 }
0x19eb   :  { %v2442_v37 = vpop.xlane.xlu0 %2441 }
0x19ec   :  { %3996 = vrcp.f32 %v2442_v37 }
0x19ef   :  { %v3906_v60 = vpop.permute.xlu0 %3905 }
0x19f0   :  { %v3908_v62 = vunpack.i.h.bf16 %v3906_v60  ;;  %v3907_v63 = vunpack.i.l.bf16 %v3906_v60  ;;  %v3172_v60 = vld [vmem:[%s4744_s4 + $0x14] ss:$0 sm:$0xff] }
0x19f2   :  { %v3995_v2 = vpop.eup %3994  ;;  %v3753_v7 = vpack.c.bf16 %v3908_v62, %v3907_v63 }
0x19f3   :  { %v2445_v13 = vmul.f32 %v3995_v2, %v3991_v43  ;;  %v2539_v19 = vpop.permute.xlu0 %2538  ;;  %v2715_v43 = vld [vmem:[#allocation7 + $0x178] sm:$0xff] }
0x19f4   :  { %3754 = vmatprep.subr.bf16.mxu0 %v3753_v7  ;;  %v2559_v10 = vsel %vm352_vm3, %v4584_v42, %v2539_v19  ;;  %v3765_v56 = vpack.c.bf16 %v2715_v43, %v2714_v55 }
0x19f5   :  { %3538 = vmatprep.mubr.msk.f32.mxu0 %vm440_vm5, %v2445_v13 }
0x19f6   :  { %v3997_v3 = vpop.eup %3996 }
0x19f7   :  { %v2446_v1 = vmul.f32 %v3997_v3, %v3993_v47  ;;  %v2547_v11 = vpop.permute.xlu0 %2546  ;;  %v2826_v3 = vld [vmem:[#allocation7 + $0x1a0] sm:$0xff] }
0x19f8   :  { %v2561_v27 = vsel %vm440_vm5, %v2559_v10, %v2547_v11  ;;  %v2831_v11 = vld [vmem:[#allocation7 + $0x1c8] sm:$0xff]  ;;  %v3174_v10 = vld [vmem:[%s4744_s4 + $0x11] ss:$0 sm:$0xff] }
0x19f9   :  { %3539 = vmatmul.mubr.msk.f32.vlgmr.msra.gmra.mrb[14].mxu0 %vm440_vm5, %v2446_v1  ;;  %v2828_v1 = vld [vmem:[#allocation7 + $0x1b0] sm:$0xff]  ;;  %v3777_v14 = vpack.c.bf16 %v2831_v11, %v2830_v20 }
0x19fa   :  { %3756 = vmatpush3.bf16.msra.mxu0 %v3753_v7 }
0x19fb   :  { %3758 = vmatprep.subr.bf16.mxu0 %v3757_v46 }
0x19fe   :  { %3760 = vmatpush3.bf16.msra.mxu0 %v3757_v46  ;;  %v2827_v46 = vld [vmem:[#allocation7 + $0x1a8] sm:$0xff] }
0x1acc   :  { %v3540_v16 = vpop.f32.mrb[14].mxu0 }
0x1acd   :  { %2554 = vrot.lane.b32.xlu0 %v3540_v16, %s4155_s19  ;;  %v2525_v18 = vpop.f32.mrb[15].mxu0  ;;  %v3769_v16 = vpack.c.bf16 %v2827_v46, %v2826_v3 }
0x1ace   :  { %2552 = vrot.lane.b32.xlu1 %v2525_v18, %s4155_s19  ;;  %v2829_v18 = vld [vmem:[#allocation7 + $0x1b8] sm:$0xff] }
0x1acf   :  { %v3773_v19 = vpack.c.bf16 %v2829_v18, %v2828_v1  ;;  %3770 = vmatprep.subr.bf16.mxu0 %v3769_v16 }
0x1b3f   :  { %v2555_v17 = vpop.permute.xlu0 %2554 }
0x1b40   :  { %v2553_v26 = vpop.permute.xlu1 %2552  ;;  %v2563_v29 = vsel %vm1190_vm6, %v2561_v27, %v2555_v17  ;;  %v2833_v17 = vld [vmem:[#allocation7 + $0x1d8] sm:$0xff] }
0x1b41   :  { %v2562_v24 = vsel %vm1190_vm6, %v2560_v22, %v2553_v26  ;;  %v3781_v22 = vpack.c.bf16 %v2833_v17, %v2832_v15 }
0x1b42   :  { %3549 = vmatprep.mubr.msk.f32.mxu0 %vm175_vm2, %v2562_v24 }
0x1b43   :  { %3550 = vmatmul.mubr.msk.f32.vlgmr.msra.gmra.mrb[16].mxu0 %vm175_vm2, %v2563_v29 }
0x1b44   :  { %3772 = vmatpush3.bf16.msra.mxu0 %v3769_v16 }
0x1b45   :  { %3774 = vmatprep.subr.bf16.mxu0 %v3773_v19 }
0x1b48   :  { %3776 = vmatpush3.bf16.msra.mxu0 %v3773_v19  ;;  %v3182_v19 = vld [vmem:[%s4744_s4 + $0x16] ss:$0 sm:$0xff] }
0x1b49   :  { %3778 = vmatprep.subr.bf16.mxu0 %v3777_v14 }
0x1b4c   :  { %3780 = vmatpush3.bf16.msra.mxu0 %v3777_v14  ;;  %v3183_v14 = vld [vmem:[%s4744_s4 + $0x17] ss:$0 sm:$0xff] }
0x1b4d   :  { %3782 = vmatprep.subr.bf16.mxu0 %v3781_v22 }
0x1b50   :  { %3784 = vmatpush3.bf16.msra.mxu0 %v3781_v22 }
0x1c16   :  { %v3551_v28 = vpop.f32.mrb[16].mxu0 }
0x1c17   :  { %v2667_v30 = vadd.f32 %v3551_v28, %v3169_v45  ;;  %v2661_v32 = vpop.f32.mrb[17].mxu0 }
0x1c18   :  { %v2662_v33 = vadd.f32 %v3169_v45, %v2661_v32 }
0x1c19   :  { %v2671_v42 = vadd.f32 %v2667_v30, %v4489_v61 }
0x1c1a   :  { %v2670_v35 = vadd.f32 %v2662_v33, %v4487_v23  ;;  %v2712_v23 = vld [vmem:[#allocation7 + $0x160] sm:$0xff] }
0x1c1b   :  { %v2677_v36 = vsel %vm175_vm2, %v2671_v42, 0.0  ;;  %v3761_v54 = vpack.c.bf16 %v2713_v53, %v2712_v23 }
0x1c1c   :  { %2678 = vadd.xlane.f32.xlu0 %v2677_v36  ;;  %v2674_v31 = vsel %vm175_vm2, %v2670_v35, 0.0 }
0x1c1d   :  { %2675 = vadd.xlane.f32.xlu1 %v2674_v31  ;;  %3762 = vmatprep.subr.bf16.mxu1 %v3761_v54 }
0x1c1e   :  { %3764 = vmatpush3.bf16.msra.mxu1 %v3761_v54 }
0x1c1f   :  { %3766 = vmatprep.subr.bf16.mxu1 %v3765_v56 }
0x1c22   :  { %3768 = vmatpush3.bf16.msra.mxu1 %v3765_v56 }
0x1ca9   :  { %v2679_v38 = vpop.xlane.xlu0 %2678 }
0x1caa   :  { %v2681_v39 = vmul.f32 0.03125, %v2679_v38  ;;  %v2676_v40 = vpop.xlane.xlu1 %2675 }
0x1cab   :  { %v2680_v41 = vmul.f32 0.03125, %v2676_v40 }
0x1cac   :  { %v2683_v48 = vsub.f32 %v2671_v42, %v2681_v39 }
0x1cad   :  { %v2682_v49 = vsub.f32 %v2670_v35, %v2680_v41 }
0x1cae   :  { %v2685_v50 = vmul.f32 %v2683_v48, %v2683_v48 }
0x1caf   :  { %v2684_v51 = vmul.f32 %v2682_v49, %v2682_v49 }
0x1cb0   :  { %v2689_v52 = vsel %vm175_vm2, %v2685_v50, 0.0 }
0x1cb1   :  { %2690 = vadd.xlane.f32.xlu1 %v2689_v52  ;;  %v2686_v61 = vsel %vm175_vm2, %v2684_v51, 0.0 }
0x1cb2   :  { %2687 = vadd.xlane.f32.xlu0 %v2686_v61 }
0x1d3e   :  { %v2691_v47 = vpop.xlane.xlu1 %2690 }
0x1d3f   :  { %v2693_v25 = vmul.f32 0.03125, %v2691_v47  ;;  %v2688_v57 = vpop.xlane.xlu0 %2687 }
0x1d40   :  { %v2692_v58 = vmul.f32 0.03125, %v2688_v57 }
0x1d41   :  { %v2695_v34 = vadd.f32 1e-06, %v2693_v25 }
0x1d42   :  { %v2694_v59 = vadd.f32 1e-06, %v2692_v58 }
0x1d43   :  { %3998 = vrsqrt.f32 %v2695_v34 }
0x1d44   :  { %4000 = vrsqrt.f32 %v2694_v59 }
0x1d4d   :  { %v3999_v37 = vpop.eup %3998 }
0x1d4e   :  { %v4001_v62 = vpop.eup %4000  ;;  %v2699_v63 = vmul.f32 %v3999_v37, %v2683_v48 }
0x1d4f   :  { %v2698_v2 = vmul.f32 %v4001_v62, %v2682_v49  ;;  %v3179_v49 = vld [vmem:[%s4744_s4 + $0x13] ss:$0 sm:$0xff]  ;;  %v2964_v62 = vld [vmem:[#allocation7 + $0x80] sm:$0xff] }
0x1d50   :  { %v2705_v7 = vmul.f32 %v3172_v60, %v2699_v63  ;;  %v2965_v63 = vld [vmem:[#allocation7 + $0x88] sm:$0xff] }
0x1d51   :  { %v2704_v9 = vmul.f32 %v3172_v60, %v2698_v2  ;;  %v3785_v2 = vpack.c.bf16 %v2965_v63, %v2964_v62 }
0x1d52   :  { %v2711_v13 = vadd.f32 %v3173_v5, %v2705_v7  ;;  %v2967_v7 = vld [vmem:[#allocation7 + $0x98] sm:$0xff] }
0x1d53   :  { %v2710_v12 = vadd.f32 %v3173_v5, %v2704_v9  ;;  %3786 = vmatprep.subr.bf16.mxu1 %v3785_v2  ;;  %v2966_v5 = vld [vmem:[#allocation7 + $0x90] sm:$0xff] }
0x1d54   :  { %v3789_v9 = vpack.c.bf16 %v2967_v7, %v2966_v5 }
0x1d55   :  { %3560 = vmatprep.mubr.msk.f32.mxu1 %vm175_vm2, %v2710_v12 }
0x1d56   :  { %3561 = vmatmul.mubr.msk.f32.vlgmr.msra.gmra.mrb[28].mxu1 %vm175_vm2, %v2711_v13 }
0x1d57   :  { %3788 = vmatpush3.bf16.msra.mxu1 %v3785_v2 }
0x1d58   :  { %3790 = vmatprep.subr.bf16.mxu1 %v3789_v9 }
0x1d5b   :  { %3792 = vmatpush3.bf16.msra.mxu1 %v3789_v9 }
0x1e29   :  { %v3562_v26 = vpop.f32.mrb[28].mxu1 }
0x1e2a   :  { %v2799_v27 = vadd.f32 %v3562_v26, %v3174_v10  ;;  %v2793_v24 = vpop.f32.mrb[29].mxu1 }
0x1e2b   :  { %v2794_v29 = vadd.f32 %v3174_v10, %v2793_v24 }
0x1e2c   :  { %2820 = vrot.lane.b32.xlu1 %v2799_v27, %s4144_s8  ;;  %v3178_v28 = vmul.f32 -1.442695, %v2799_v27 }
0x1e2d   :  { %2818 = vrot.lane.b32.xlu0 %v2794_v29, %s4144_s8  ;;  %v3177_v45 = vmul.f32 -1.442695, %v2794_v29 }
0x1e2f   :  { %4002 = vpow2.f32 %v3177_v45 }
0x1e30   :  { %4004 = vpow2.f32 %v3178_v28 }
0x1e39   :  { %v4003_v30 = vpop.eup %4002 }
0x1e3a   :  { %v4005_v32 = vpop.eup %4004  ;;  %v2808_v33 = vadd.f32 1.0, %v4003_v30 }
0x1e3b   :  { %v2809_v42 = vadd.f32 1.0, %v4005_v32 }
0x1e3c   :  { %4006 = vrcp.f32 %v2808_v33 }
0x1e3d   :  { %4008 = vrcp.f32 %v2809_v42 }
0x1e46   :  { %v4007_v35 = vpop.eup %4006 }
0x1e47   :  { %v4009_v36 = vpop.eup %4008  ;;  %v2814_v38 = vmul.f32 %v4007_v35, %v2794_v29 }
0x1e48   :  { %v2815_v39 = vmul.f32 %v4009_v36, %v2799_v27 }
0x1e9e   :  { %v2821_v31 = vpop.permute.xlu1 %2820 }
0x1e9f   :  { %v2819_v40 = vpop.permute.xlu0 %2818  ;;  %v2825_v48 = vmul.f32 %v2821_v31, %v2815_v39 }
0x1ea0   :  { %v2824_v41 = vmul.f32 %v2819_v40, %v2814_v38 }
0x1ea2   :  { %3579 = vmatprep.mubr.msk.f32.mxu0 %vm1468_vm7, %v2824_v41 }
0x1ea3   :  { %3580 = vmatmul.mubr.msk.f32.vlgmr.msra.gmra.mrb[18].mxu0 %vm1468_vm7, %v2825_v48 }
0x1f76   :  { %v3581_v50 = vpop.f32.mrb[18].mxu0 }
0x1f77   :  { %v2917_v51 = vadd.f32 %v3581_v50, %v3179_v49  ;;  %v2911_v52 = vpop.f32.mrb[19].mxu0 }
0x1f78   :  { %v2912_v61 = vadd.f32 %v3179_v49, %v2911_v52 }
0x1f79   :  { %v2921_v23 = vadd.f32 %v2917_v51, %v2711_v13 }
0x1f7a   :  { %v2920_v53 = vadd.f32 %v2912_v61, %v2710_v12 }
0x1f7b   :  { %v2927_v54 = vsel %vm175_vm2, %v2921_v23, 0.0 }
0x1f7c   :  { %2928 = vadd.xlane.f32.xlu0 %v2927_v54  ;;  %v2924_v55 = vsel %vm175_vm2, %v2920_v53, 0.0 }
0x1f7d   :  { %2925 = vadd.xlane.f32.xlu1 %v2924_v55 }
0x2009   :  { %v2929_v43 = vpop.xlane.xlu0 %2928 }
0x200a   :  { %v2931_v56 = vmul.f32 0.03125, %v2929_v43  ;;  %v2926_v47 = vpop.xlane.xlu1 %2925 }
0x200b   :  { %v2930_v25 = vmul.f32 0.03125, %v2926_v47 }
0x200c   :  { %v2933_v57 = vsub.f32 %v2921_v23, %v2931_v56 }
0x200d   :  { %v2932_v58 = vsub.f32 %v2920_v53, %v2930_v25 }
0x200e   :  { %v2935_v34 = vmul.f32 %v2933_v57, %v2933_v57 }
0x200f   :  { %v2934_v59 = vmul.f32 %v2932_v58, %v2932_v58 }
0x2010   :  { %v2939_v37 = vsel %vm175_vm2, %v2935_v34, 0.0 }
0x2011   :  { %2940 = vadd.xlane.f32.xlu1 %v2939_v37  ;;  %v2936_v60 = vsel %vm175_vm2, %v2934_v59, 0.0 }
0x2012   :  { %2937 = vadd.xlane.f32.xlu0 %v2936_v60 }
0x2022   :  { %345 = vrot.lane.b32.xlu1 %v4278_v6, %s4143_s25 }
0x2026   :  { %1702 = vrot.lane.b32.xlu1 %v4518_v44, %s4156_s16 }
0x2028   :  { %343 = vrot.lane.b32.xlu0 %v4282_v8, %s4143_s25 }
0x202a   :  { %1713 = vrot.lane.b32.xlu1 %v4500_v4, %s4156_s16 }
0x202c   :  { %1704 = vrot.lane.b32.xlu0 %v4520_v21, %s4156_s16 }
0x2030   :  { %1715 = vrot.lane.b32.xlu0 %v4498_v0, %s4156_s16 }
0x209e   :  { %v2941_v6 = vpop.xlane.xlu1 %2940 }
0x209f   :  { %v2943_v44 = vmul.f32 0.03125, %v2941_v6  ;;  %v2938_v12 = vpop.xlane.xlu0 %2937 }
0x20a0   :  { %v2942_v8 = vmul.f32 0.03125, %v2938_v12 }
0x20a1   :  { %v2945_v4 = vadd.f32 1e-06, %v2943_v44 }
0x20a2   :  { %v2944_v13 = vadd.f32 1e-06, %v2942_v8  ;;  %v346_v3 = vpop.permute.xlu1 %345 }
0x20a3   :  { %4010 = vrsqrt.f32 %v2945_v4  ;;  %351 = vst.msk [vmem:[%s4747_s7 + $0x8] sm:$0xff] %vm349_vm8, %v346_v3  ;;  %v344_v21 = vpop.permute.xlu0 %343 }
0x20a4   :  { %4012 = vrsqrt.f32 %v2944_v13  ;;  %350 = vst.msk [vmem:[%s4747_s7] sm:$0xff] %vm349_vm8, %v344_v21 }
0x20a6   :  { %v1703_v0 = vpop.permute.xlu1 %1702 }
0x20a7   :  { %1709 = vst.msk [vmem:[%s4747_s7] sm:$0xff] %vm1708_vm9, %v1703_v0  ;;  %v1705_v46 = vpop.permute.xlu0 %1704 }
0x20a8   :  { %1710 = vst.msk [vmem:[%s4747_s7 + $0x8] sm:$0xff] %vm1708_vm9, %v1705_v46 }
0x20aa   :  { %v1714_v1 = vpop.permute.xlu1 %1713 }
0x20ab   :  { %1720 = vst.msk [vmem:[%s4747_s7] sm:$0xff] %vm1719_vm10, %v1714_v1  ;;  %v1716_v16 = vpop.permute.xlu0 %1715 }
0x20ac   :  { %1721 = vst.msk [vmem:[%s4747_s7 + $0x8] sm:$0xff] %vm1719_vm10, %v1716_v16  ;;  %s4157_s7 = smov [#allocation9]  }
0x20ad   :  { %v4011_v18 = vpop.eup %4010  ;;  %s3073_s9 = sshll.u32 %s4157_s7, 4  ;;  %s3074_s9 = int_to_ptr.vmem [resolvable:$true] %s3073_s9 }
0x20ae   :  { %v4013_v20 = vpop.eup %4012  ;;  %v2949_v11 = vmul.f32 %v4011_v18, %v2933_v57  ;;  %s4082_s10 = scalar_lea.vmem %s3074_s9, 256  ;;  %p4087_p11 = scmp.lt.s32.totalorder %s3074_s9, %s3074_s9 }
0x20af   :  { %v2948_v15 = vmul.f32 %v4013_v20, %v2932_v58  ;;  %p4083_p10 = scmp.ne.s32.totalorder %s3074_s9, %s4082_s10  ;;  %p4088_p12 = scmp.lt.s32.totalorder %s4082_s10, %s4082_s10 }
0x20b0   :  { %v2955_v17 = vmul.f32 %v3182_v19, %v2949_v11 }
0x20b1   :  { %v2954_v22 = vmul.f32 %v3182_v19, %v2948_v15  ;;  %p4089_p13 = por %p4088_p12, %p4087_p11 }
0x20b2   :  { %v2961_v10 = vadd.f32 %v3183_v14, %v2955_v17 }
0x20b3   :  { %v2960_v26 = vadd.f32 %v3183_v14, %v2954_v22  ;;  %p4090_p0 = pnand %p4089_p13, %p4083_p10 }
0x20b4   :  { %2963 = vst.msk [vmem:[#allocation9 + $0x8] sm:$0xff] %vm175_vm2, %v2961_v10 }
0x20b5   :  { %3590 = vmatprep.mubr.msk.f32.mxu1 %vm175_vm2, %v2960_v26  ;;  %2962 = vst.msk [vmem:[#allocation9] sm:$0xff] %vm175_vm2, %v2960_v26 }
0x20b6   :  { %3591 = vmatmul.mubr.msk.f32.vlgmr.msra.gmra.mrb[30].mxu1 %vm175_vm2, %v2961_v10 }
0x20b7   :  { %4093 = shalt.err (!%p4090_p0)
}
0x20b8   :  { %s4094_s15 = scalar_lea.hbm %s4746_s6, 256 }
0x20b9   :  { %p4095_p1 = scmp.ne.s32.totalorder %s4746_s6, %s4094_s15  ;;  %p4098_p2 = scmp.lt.u32.totalorder %s4094_s15, %s4746_s6 }
0x20bb   :  { %p4100_p3 = pnand %p4098_p2, %p4095_p1 }
0x20bd   :  { %4103 = shalt.err (!%p4100_p3)
}
0x20be   :  { %3079 = dma.vmem_to_hbm [thread:$0]  %s3074_s9, 256, %s4746_s6, [#allocation10], %s4136_s13, %s4136_s13, %s4137_s14  }
0x20bf   :  { %v3184_v27 = vld [vmem:[%s4744_s4 + $0x2] ss:$0 sm:$0xff]  ;;  %s4158_s26 = smov [#allocation8]  }
0x20c0   :  { %s3061_s28 = sshll.u32 %s4158_s26, 4  ;;  %s3062_s28 = int_to_ptr.vmem [resolvable:$true] %s3061_s28 }
0x20c1   :  { %s4104_s29 = scalar_lea.vmem %s3062_s28, 256  ;;  %p4109_p5 = scmp.lt.s32.totalorder %s3062_s28, %s3062_s28 }
0x20c2   :  { %p4105_p4 = scmp.ne.s32.totalorder %s3062_s28, %s4104_s29  ;;  %p4110_p6 = scmp.lt.s32.totalorder %s4104_s29, %s4104_s29 }
0x20c4   :  { %p4111_p7 = por %p4110_p6, %p4109_p5 }
0x20c6   :  { %p4112_p8 = pnand %p4111_p7, %p4105_p4 }
0x2189   :  { %v3592_v24 = vpop.f32.mrb[30].mxu1 }
0x218a   :  { %v3051_v29 = vadd.f32 %v3592_v24, %v3184_v27  ;;  %v3045_v45 = vpop.f32.mrb[31].mxu1 }
0x218b   :  { %v3046_v28 = vadd.f32 %v3184_v27, %v3045_v45 }
0x218c   :  { %3055 = vst [vmem:[#allocation8 + $0x8] sm:$0xff] %v3051_v29 }
0x218d   :  { %3054 = vst [vmem:[#allocation8] sm:$0xff] %v3046_v28 }
0x218e   :  { %4115 = shalt.err (!%p4112_p8)
}
0x218f   :  { %s4116_s4 = scalar_lea.hbm %s4745_s5, 256 }
0x2190   :  { %p4117_p9 = scmp.ne.s32.totalorder %s4745_s5, %s4116_s4  ;;  %p4120_p10 = scmp.lt.u32.totalorder %s4116_s4, %s4745_s5 }
0x2192   :  { %p4122_p11 = pnand %p4120_p10, %p4117_p9 }
0x2194   :  { %4125 = shalt.err (!%p4122_p11)
}
0x2195   :  { %3067 = dma.vmem_to_hbm [thread:$0]  %s3062_s28, 256, %s4745_s5, [#allocation4], %s4136_s13, %s4136_s13, %s4137_s14  }
0x2196   :  { %4130 = dma.done.wait [#allocation4], 256  }
0x2197   :  { %4131 = vsyncadd [#allocation4], 4294967040 }
0x2198   :  { %4132 = dma.done.wait [#allocation10], 256  }
0x2199   :  { %4133 = vsyncadd [#allocation10], 4294967040 }
0x219a   :  { %3090 = vsyncpa [#allocation3], 1 }
0x219b   :  { %3091 = vsyncpa [#allocation6], 1 }
0x219c   :  { %3092 = vsyncpa [#allocation4], 1 }
0x219d   :  { %3093 = vsyncpa [#allocation10], 1 }

</bundles_post_ra>
